<compile_context>
chip_gen: v5e
topology: v5e:2x2
jax: 0.10.0
libtpu: 0.0.40
codegen_flags: <defaults>
</compile_context>

<pallas_src>
import jax
import jax.numpy as jnp
from jax import lax
from jax.experimental import pallas as pl
from jax.experimental.pallas import tpu as pltpu

EPS = 1e-5
NEG_SLOPE = 0.1


def _lrelu(x):
    return jnp.where(x > 0, x, NEG_SLOPE * x)


# ------------------------------------------------------------- fused kernel --

def _make_decoder_kernel(num_conv):
    """Kernel for one grid step: M = samples_per_step*H rows, lane dim = W*C."""

    def kernel(xs_ref, xu_ref, shft_ref, expm_ref, wup_ref, wc0s_ref, wc0u_ref,
               wres_ref, aff_ref, o_ref):
        f32 = jnp.float32
        WC = xs_ref.shape[1]

        sdn = shft_ref[0]        # (M, M): out[i] += p0[i-1]  (sample-local)
        sup = shft_ref[1]        # (M, M): out[i] += p2[i+1]  (sample-local)

        def act(h, r):
            # folded BN affine (+ folded conv bias) then LeakyReLU.  Each
            # affine row is consumed exactly once, so a (1, WC) slice with
            # implicit broadcast is as good as a stride-0 broadcast load.
            y = h * aff_ref[r:r + 1, :] + aff_ref[r + 1:r + 2, :]
            return jnp.where(y > 0, y, NEG_SLOPE * y)

        def conv3(pieces):
            # 3x3 conv, padding=1, in lane-dense (rows, W*C) layout:
            #   p_kh = sum_i h_i @ band_i[kh];  out = Sdn@p0 + p1 + Sup@p2.
            # Horizontal zero padding is baked into the bands; the vertical
            # halo and per-sample boundaries live in Sdn/Sup, so there is no
            # padded scratch buffer and no VMEM store->reload round trip.
            out = None
            for kh in range(3):
                p = None
                for h, bands in pieces:
                    d = jnp.dot(h, bands[kh], preferred_element_type=f32)
                    p = d if p is None else p + d
                if kh == 0:
                    p = jnp.dot(sdn, p, preferred_element_type=f32)
                elif kh == 2:
                    p = jnp.dot(sup, p, preferred_element_type=f32)
                out = p if out is None else out + p
            return out

        # ---- up path: ConvTranspose2d(2C->C, k=2, s=2) as ONE matmul whose
        #      column halves hold the even-/odd-row outputs; they are placed
        #      onto full-resolution rows with two 0/1 row-scatter matmuls
        #      (no masked interleave stores), then folded BN + LReLU.
        y = jnp.dot(xu_ref[...], wup_ref[...], preferred_element_type=f32)  # (M/2, 2*WC)
        u = (jnp.dot(expm_ref[0], y[:, :WC], preferred_element_type=f32)
             + jnp.dot(expm_ref[1], y[:, WC:], preferred_element_type=f32))  # (M, WC)
        u = act(u, 0)

        # ---- conv0 over the channel concat [skip | up], realized as split-K:
        #      the concatenated tensor is never materialized.
        wc0s = (wc0s_ref[0], wc0s_ref[1], wc0s_ref[2])
        wc0u = (wc0u_ref[0], wc0u_ref[1], wc0u_ref[2])
        x = act(conv3([(xs_ref[...], wc0s), (u, wc0u)]), 2)

        # ---- residual blocks: x + Conv(LReLU(BN(Conv(LReLU(BN(x))))))
        for k in range(num_conv):
            r = 4 + 5 * k
            b1 = (wres_ref[2 * k, 0], wres_ref[2 * k, 1], wres_ref[2 * k, 2])
            b2 = (wres_ref[2 * k + 1, 0], wres_ref[2 * k + 1, 1], wres_ref[2 * k + 1, 2])
            h = act(x, r)                       # BN1 + LReLU
            h = conv3([(h, b1)])                # conv1 (bias folded into BN2)
            h = act(h, r + 2)                   # BN2 + LReLU
            h = conv3([(h, b2)])                # conv2 (bias added below)
            x = x + h + aff_ref[r + 4:r + 5, :]

        o_ref[...] = x.astype(o_ref.dtype)      # lane-dense (M, W*C) store

    return kernel


# -------------------------------------------------- host-side (one-time) prep

def _band_conv3x3(wt, W):
    """Torch Conv2d weight (Cout, Cin, 3, 3) -> (3, W*Cin, W*Cout) bands.

    p_kh = x_lane_dense @ band[kh]; horizontal zero padding is baked in; the
    full conv output is out[i] = p0[i-1] + p1[i] + p2[i+1] (handled by Sdn/Sup).
    """
    Cout, Cin = wt.shape[0], wt.shape[1]
    wk = jnp.transpose(wt, (2, 3, 1, 0)).astype(jnp.float32)    # (kh, kw, Cin, Cout)
    j = jnp.arange(W)
    bands = []
    for kh in range(3):
        Mx = jnp.zeros((W + 2, Cin, W, Cout), jnp.float32)
        for kw in range(3):
            Mx = Mx.at[j + kw, :, j, :].set(wk[kh, kw])
        bands.append(Mx[1:W + 1].reshape(W * Cin, W * Cout))
    return jnp.stack(bands)


def _band_convT2x2(wt, w_in, W, Cout):
    """Torch ConvTranspose2d weight (Cin, Cout, 2, 2) -> (w_in*Cin, 2*W*Cout).

    y = xu_lane_dense @ band;  y[i, di*W*Cout + (2j+dj)*Cout + co] is the
    k=2, s=2 transposed-conv output at pixel (2i+di, 2j+dj), channel co.
    """
    Cin = wt.shape[0]
    j = jnp.arange(w_in)
    Mx = jnp.zeros((w_in, Cin, 2, W, Cout), jnp.float32)
    for dj in range(2):
        v = jnp.transpose(wt[:, :, :, dj], (0, 2, 1)).astype(jnp.float32)  # (Cin, 2, Cout)
        Mx = Mx.at[j, :, :, 2 * j + dj, :].set(v)
    return Mx.reshape(w_in * Cin, 2 * W * Cout)


def _shift_mats(M, H):
    """(2, M, M) 0/1 matrices: Sdn@p shifts rows down by one, Sup@p up by one,
    with zeros at every per-sample (H-row) boundary (the vertical conv halo)."""
    r = jnp.arange(M)
    dn = (r[None, :] == r[:, None] - 1) & (r[:, None] % H != 0)
    up = (r[None, :] == r[:, None] + 1) & (r[:, None] % H != H - 1)
    return jnp.stack([dn, up]).astype(jnp.float32)


def _row_expand_mats(samples, H, hh):
    """(2, samples*H, samples*hh) 0/1 scatter matrices: E0 places the even-row
    half of the ConvTranspose output, E1 the odd-row half (output rows 2i and
    2i+1 of each sample both come from up-input row i)."""
    M = samples * H
    r = jnp.arange(M)
    i = r % H
    src = (r // H) * hh + i // 2
    e = jnp.arange(samples * hh)[None, :] == src[:, None]
    e0 = e & (i % 2 == 0)[:, None]
    e1 = e & (i % 2 == 1)[:, None]
    return jnp.stack([e0, e1]).astype(jnp.float32)


def fold_bn(bn):
    gamma, beta, mean, var = bn
    scale = gamma / jnp.sqrt(var + EPS)
    shift = beta - mean * scale
    return scale, shift


def make_decoder_block(params, *, H, W, batch, num_grid_steps=1):
    """One-time prep: build kernel-ready constants, return a jitted forward.

    The returned fn maps NCHW (x_up: (B,2C,H/2,W/2), x_skip: (B,C,H,W)) ->
    (B,C,H,W), matching PyTorch DecoderBlock with num_x=2 (one skip tensor).
    num_grid_steps=1 folds the whole batch into the matmul M dimension (best
    on single-TC v5e/v6e); num_grid_steps=B gives a parallel grid axis for
    v7x's two TensorCores.
    """
    C = params["up_w"].shape[1]
    hh, ww = H // 2, W // 2
    WC, w2c = W * C, ww * 2 * C
    num_conv = len(params["res"])
    assert batch % num_grid_steps == 0
    spb = batch // num_grid_steps            # samples folded into M per step
    M, Mh = spb * H, spb * hh

    # -- kernel-ready constants, built ONCE (outside the per-call jit path) ---
    wup = _band_convT2x2(params["up_w"], ww, W, C)               # (ww*2C, 2*WC)
    wc0s = _band_conv3x3(params["c0_w"][:, :C], W)               # skip half
    wc0u = _band_conv3x3(params["c0_w"][:, C:], W)               # up half
    if num_conv > 0:
        wres = jnp.stack([_band_conv3x3(w, W)
                          for rb in params["res"]
                          for w in (rb["w1"], rb["w2"])])        # (2n, 3, WC, WC)
    else:
        wres = jnp.zeros((1, 3, WC, WC), jnp.float32)            # unused placeholder
    shft = _shift_mats(M, H)                                     # (2, M, M)
    expm = _row_expand_mats(spb, H, hh)                          # (2, M, Mh)

    s_up, t_up = fold_bn(params["up_bn"])
    t_up = params["up_b"] * s_up + t_up
    s0, t0 = fold_bn(params["c0_bn"])
    t0 = params["c0_b"] * s0 + t0
    rows = [jnp.tile(s_up, W), jnp.tile(t_up, W), jnp.tile(s0, W), jnp.tile(t0, W)]
    for rb in params["res"]:
        s1, t1 = fold_bn(rb["bn1"])
        s2, t2 = fold_bn(rb["bn2"])
        t2 = rb["b1"] * s2 + t2                  # fold conv1 bias into BN2 shift
        rows += [jnp.tile(s1, W), jnp.tile(t1, W),
                 jnp.tile(s2, W), jnp.tile(t2, W), jnp.tile(rb["b2"], W)]
    aff = jnp.stack(rows)                                        # (4+5n, WC)

    kernel = _make_decoder_kernel(num_conv)

    call = pl.pallas_call(
        kernel,
        out_shape=jax.ShapeDtypeStruct((batch * H, WC), jnp.float32),
        grid=(num_grid_steps,),
        in_specs=[
            pl.BlockSpec((M, WC), lambda n: (n, 0)),             # skip rows
            pl.BlockSpec((Mh, w2c), lambda n: (n, 0)),           # up-input rows
            pl.BlockSpec(shft.shape, lambda n: (0, 0, 0)),
            pl.BlockSpec(expm.shape, lambda n: (0, 0, 0)),
            pl.BlockSpec(wup.shape, lambda n: (0, 0)),
            pl.BlockSpec(wc0s.shape, lambda n: (0, 0, 0)),
            pl.BlockSpec(wc0u.shape, lambda n: (0, 0, 0)),
            pl.BlockSpec(wres.shape, lambda n: (0, 0, 0, 0)),
            pl.BlockSpec(aff.shape, lambda n: (0, 0)),
        ],
        out_specs=pl.BlockSpec((M, WC), lambda n: (n, 0)),
        compiler_params=pltpu.CompilerParams(
            dimension_semantics=("parallel",)),
    )

    def fwd(x_up, x_skip):
        B = x_skip.shape[0]
        # lane-dense layout: rows = (sample, image row), lanes = (col, channel)
        xs = jnp.transpose(x_skip, (0, 2, 3, 1)).reshape(B * H, WC)
        xu = jnp.transpose(x_up, (0, 2, 3, 1)).reshape(B * hh, w2c)
        out = call(xs, xu, shft, expm, wup, wc0s, wc0u, wres, aff)
        # NOTE: in a full UNet++, adjacent stages should exchange the lane-
        # dense (rows, W*C) layout directly and skip these NCHW transposes.
        return jnp.transpose(out.reshape(B, H, W, C), (0, 3, 1, 2))

    return jax.jit(fwd)


# ---------------------------------------------------------- pure-JAX reference

def _bn_ref(x, bn):
    gamma, beta, mean, var = bn
    inv = gamma / jnp.sqrt(var + EPS)
    return (x - mean[None, :, None, None]) * inv[None, :, None, None] + beta[None, :, None, None]


def _conv_ref(x, w, b):
    y = lax.conv_general_dilated(x, w, (1, 1), ((1, 1), (1, 1)),
                                 dimension_numbers=("NCHW", "OIHW", "NCHW"))
    return y + b[None, :, None, None]


def _convT_ref(x, w, b):
    # stride=2, kernel=2 transposed conv
    y = jnp.einsum("nchw,cdij->ndhiwj", x, w)
    N, D, Hh, _, Ww, _ = y.shape
    return y.reshape(N, D, 2 * Hh, 2 * Ww) + b[None, :, None, None]


def decoder_block_ref(params, x_up, x_skip):
    u = _lrelu(_bn_ref(_convT_ref(x_up, params["up_w"], params["up_b"]), params["up_bn"]))
    x = jnp.concatenate([x_skip, u], axis=1)
    x = _lrelu(_bn_ref(_conv_ref(x, params["c0_w"], params["c0_b"]), params["c0_bn"]))
    for rb in params["res"]:
        h = _conv_ref(_lrelu(_bn_ref(x, rb["bn1"])), rb["w1"], rb["b1"])
        h = _conv_ref(_lrelu(_bn_ref(h, rb["bn2"])), rb["w2"], rb["b2"])
        x = x + h
    return x


# ------------------------------------------------------------------ params ---

def init_decoder_params(key, C, num_conv=2):
    kit = iter(jax.random.split(key, 64))
    nk = lambda: next(kit)

    def bn_p():
        return (1.0 + 0.1 * jax.random.normal(nk(), (C,), jnp.float32),
                0.1 * jax.random.normal(nk(), (C,), jnp.float32),
                0.1 * jax.random.normal(nk(), (C,), jnp.float32),
                1.0 + 0.1 * jax.random.uniform(nk(), (C,), jnp.float32))

    def conv_p(cin, cout):
        return (0.1 * jax.random.normal(nk(), (cout, cin, 3, 3), jnp.float32),
                0.05 * jax.random.normal(nk(), (cout,), jnp.float32))

    params = {
        "up_w": 0.1 * jax.random.normal(nk(), (2 * C, C, 2, 2), jnp.float32),
        "up_b": 0.05 * jax.random.normal(nk(), (C,), jnp.float32),
        "up_bn": bn_p(),
    }
    params["c0_w"], params["c0_b"] = conv_p(2 * C, C)
    params["c0_bn"] = bn_p()
    res = []
    for _ in range(num_conv):
        rb = {}
        rb["bn1"] = bn_p()
        rb["w1"], rb["b1"] = conv_p(C, C)
        rb["bn2"] = bn_p()
        rb["w2"], rb["b2"] = conv_p(C, C)
        res.append(rb)
    params["res"] = res
    return params


# -------------------------------------------------------------------- main ---

if __name__ == "__main__":
    key = jax.random.PRNGKey(0)
    k_p, k_up, k_skip = jax.random.split(key, 3)

    C = 8          # in_channels
    B = 2
    H = W = 16     # spatial size of the skip feature; x_up is at half resolution

    params = init_decoder_params(k_p, C, num_conv=2)
    x_up = jax.random.normal(k_up, (B, 2 * C, H // 2, W // 2), jnp.float32)
    x_skip = jax.random.normal(k_skip, (B, C, H, W), jnp.float32)

    # one-time prep (band matrices, folded affines, shift/scatter mats) + jit
    fwd = make_decoder_block(params, H=H, W=W, batch=B, num_grid_steps=1)
    out = jax.block_until_ready(fwd(x_up, x_skip))

    ref = decoder_block_ref(params, x_up, x_skip)
    assert out.shape == (B, C, H, W), out.shape
    max_err = float(jnp.max(jnp.abs(out - ref)))
    assert jnp.allclose(out, ref, atol=1e-2, rtol=1e-2), max_err

    print("KERNEL_OK")
</pallas_src>

<mosaic_0001>
module attributes {stable_mosaic.version = 11 : i64} {
  func.func @kernel(%arg0: i32, %arg1: memref<32x128xf32, #tpu.memory_space<vmem>>, %arg2: memref<16x128xf32, #tpu.memory_space<vmem>>, %arg3: memref<2x32x32xf32, #tpu.memory_space<vmem>>, %arg4: memref<2x32x16xf32, #tpu.memory_space<vmem>>, %arg5: memref<128x256xf32, #tpu.memory_space<vmem>>, %arg6: memref<3x128x128xf32, #tpu.memory_space<vmem>>, %arg7: memref<3x128x128xf32, #tpu.memory_space<vmem>>, %arg8: memref<4x3x128x128xf32, #tpu.memory_space<vmem>>, %arg9: memref<14x128xf32, #tpu.memory_space<vmem>>, %arg10: memref<32x128xf32, #tpu.memory_space<vmem>>) attributes {dimension_semantics = [#tpu.dimension_semantics<parallel>], iteration_bounds = array<i64: 1>, scalar_prefetch = 0 : i64, scratch_operands = 0 : i64, tpu.core_type = #tpu.core_type<tc>, window_params = [{transform_indices = @transform_0, window_bounds = array<i64: 32, 128>}, {transform_indices = @transform_1, window_bounds = array<i64: 16, 128>}, {pipeline_mode = #tpu.pipeline_mode<synchronous>, transform_indices = @transform_2, window_bounds = array<i64: 2, 32, 32>}, {pipeline_mode = #tpu.pipeline_mode<synchronous>, transform_indices = @transform_3, window_bounds = array<i64: 2, 32, 16>}, {pipeline_mode = #tpu.pipeline_mode<synchronous>, transform_indices = @transform_4, window_bounds = array<i64: 128, 256>}, {pipeline_mode = #tpu.pipeline_mode<synchronous>, transform_indices = @transform_5, window_bounds = array<i64: 3, 128, 128>}, {pipeline_mode = #tpu.pipeline_mode<synchronous>, transform_indices = @transform_6, window_bounds = array<i64: 3, 128, 128>}, {pipeline_mode = #tpu.pipeline_mode<synchronous>, transform_indices = @transform_7, window_bounds = array<i64: 4, 3, 128, 128>}, {pipeline_mode = #tpu.pipeline_mode<synchronous>, transform_indices = @transform_8, window_bounds = array<i64: 14, 128>}, {transform_indices = @transform_9, window_bounds = array<i64: 32, 128>}]} {
    %c0 = arith.constant 0 : index
    %c0_0 = arith.constant 0 : index
    %c0_1 = arith.constant 0 : index
    %0 = vector.load %arg3[%c0, %c0_0, %c0_1] : memref<2x32x32xf32, #tpu.memory_space<vmem>>, vector<1x32x32xf32>
    %1 = vector.shape_cast %0 : vector<1x32x32xf32> to vector<32x32xf32>
    %c1 = arith.constant 1 : index
    %c0_2 = arith.constant 0 : index
    %c0_3 = arith.constant 0 : index
    %2 = vector.load %arg3[%c1, %c0_2, %c0_3] : memref<2x32x32xf32, #tpu.memory_space<vmem>>, vector<1x32x32xf32>
    %3 = vector.shape_cast %2 : vector<1x32x32xf32> to vector<32x32xf32>
    %c0_4 = arith.constant 0 : index
    %c0_5 = arith.constant 0 : index
    %4 = vector.load %arg2[%c0_4, %c0_5] : memref<16x128xf32, #tpu.memory_space<vmem>>, vector<16x128xf32>
    %c0_6 = arith.constant 0 : index
    %c0_7 = arith.constant 0 : index
    %5 = vector.load %arg5[%c0_6, %c0_7] : memref<128x256xf32, #tpu.memory_space<vmem>>, vector<128x256xf32>
    %cst = arith.constant dense<0.000000e+00> : vector<16x256xf32>
    %6 = tpu.matmul %4, %5, %cst {dimension_numbers = #tpu.dot_dimension_numbers<[1], [0], [0], [1], [0, 0, 1, 1], [], []>} : vector<16x128xf32>, vector<128x256xf32>, vector<16x256xf32> -> vector<16x256xf32>
    %c0_8 = arith.constant 0 : index
    %c0_9 = arith.constant 0 : index
    %c0_10 = arith.constant 0 : index
    %7 = vector.load %arg4[%c0_8, %c0_9, %c0_10] : memref<2x32x16xf32, #tpu.memory_space<vmem>>, vector<1x32x16xf32>
    %8 = vector.shape_cast %7 : vector<1x32x16xf32> to vector<32x16xf32>
    %9 = vector.extract_strided_slice %6 {offsets = [0, 0], sizes = [16, 128], strides = [1, 1]} : vector<16x256xf32> to vector<16x128xf32>
    %cst_11 = arith.constant dense<0.000000e+00> : vector<32x128xf32>
    %10 = tpu.matmul %8, %9, %cst_11 {dimension_numbers = #tpu.dot_dimension_numbers<[1], [0], [0], [1], [0, 0, 1, 1], [], []>} : vector<32x16xf32>, vector<16x128xf32>, vector<32x128xf32> -> vector<32x128xf32>
    %c1_12 = arith.constant 1 : index
    %c0_13 = arith.constant 0 : index
    %c0_14 = arith.constant 0 : index
    %11 = vector.load %arg4[%c1_12, %c0_13, %c0_14] : memref<2x32x16xf32, #tpu.memory_space<vmem>>, vector<1x32x16xf32>
    %12 = vector.shape_cast %11 : vector<1x32x16xf32> to vector<32x16xf32>
    %13 = vector.extract_strided_slice %6 {offsets = [0, 128], sizes = [16, 128], strides = [1, 1]} : vector<16x256xf32> to vector<16x128xf32>
    %cst_15 = arith.constant dense<0.000000e+00> : vector<32x128xf32>
    %14 = tpu.matmul %12, %13, %cst_15 {dimension_numbers = #tpu.dot_dimension_numbers<[1], [0], [0], [1], [0, 0, 1, 1], [], []>} : vector<32x16xf32>, vector<16x128xf32>, vector<32x128xf32> -> vector<32x128xf32>
    %15 = arith.addf %10, %14 : vector<32x128xf32>
    %c0_16 = arith.constant 0 : index
    %c0_17 = arith.constant 0 : index
    %16 = vector.load %arg9[%c0_16, %c0_17] : memref<14x128xf32, #tpu.memory_space<vmem>>, vector<1x128xf32>
    %17 = vector.broadcast %16 : vector<1x128xf32> to vector<32x128xf32>
    %18 = arith.mulf %15, %17 : vector<32x128xf32>
    %c1_18 = arith.constant 1 : index
    %c0_19 = arith.constant 0 : index
    %19 = vector.load %arg9[%c1_18, %c0_19] : memref<14x128xf32, #tpu.memory_space<vmem>>, vector<1x128xf32>
    %20 = vector.broadcast %19 : vector<1x128xf32> to vector<32x128xf32>
    %21 = arith.addf %18, %20 : vector<32x128xf32>
    %cst_20 = arith.constant 0.000000e+00 : f32
    %22 = vector.broadcast %cst_20 : f32 to vector<32x128xf32>
    %23 = arith.cmpf ogt, %21, %22 : vector<32x128xf32>
    %cst_21 = arith.constant 1.000000e-01 : f32
    %24 = vector.broadcast %cst_21 : f32 to vector<32x128xf32>
    %25 = arith.mulf %24, %21 : vector<32x128xf32>
    %26 = arith.select %23, %21, %25 : vector<32x128xi1>, vector<32x128xf32>
    %c0_22 = arith.constant 0 : index
    %c0_23 = arith.constant 0 : index
    %c0_24 = arith.constant 0 : index
    %27 = vector.load %arg6[%c0_22, %c0_23, %c0_24] : memref<3x128x128xf32, #tpu.memory_space<vmem>>, vector<1x128x128xf32>
    %28 = vector.shape_cast %27 : vector<1x128x128xf32> to vector<128x128xf32>
    %c1_25 = arith.constant 1 : index
    %c0_26 = arith.constant 0 : index
    %c0_27 = arith.constant 0 : index
    %29 = vector.load %arg6[%c1_25, %c0_26, %c0_27] : memref<3x128x128xf32, #tpu.memory_space<vmem>>, vector<1x128x128xf32>
    %30 = vector.shape_cast %29 : vector<1x128x128xf32> to vector<128x128xf32>
    %c2 = arith.constant 2 : index
    %c0_28 = arith.constant 0 : index
    %c0_29 = arith.constant 0 : index
    %31 = vector.load %arg6[%c2, %c0_28, %c0_29] : memref<3x128x128xf32, #tpu.memory_space<vmem>>, vector<1x128x128xf32>
    %32 = vector.shape_cast %31 : vector<1x128x128xf32> to vector<128x128xf32>
    %c0_30 = arith.constant 0 : index
    %c0_31 = arith.constant 0 : index
    %c0_32 = arith.constant 0 : index
    %33 = vector.load %arg7[%c0_30, %c0_31, %c0_32] : memref<3x128x128xf32, #tpu.memory_space<vmem>>, vector<1x128x128xf32>
    %34 = vector.shape_cast %33 : vector<1x128x128xf32> to vector<128x128xf32>
    %c1_33 = arith.constant 1 : index
    %c0_34 = arith.constant 0 : index
    %c0_35 = arith.constant 0 : index
    %35 = vector.load %arg7[%c1_33, %c0_34, %c0_35] : memref<3x128x128xf32, #tpu.memory_space<vmem>>, vector<1x128x128xf32>
    %36 = vector.shape_cast %35 : vector<1x128x128xf32> to vector<128x128xf32>
    %c2_36 = arith.constant 2 : index
    %c0_37 = arith.constant 0 : index
    %c0_38 = arith.constant 0 : index
    %37 = vector.load %arg7[%c2_36, %c0_37, %c0_38] : memref<3x128x128xf32, #tpu.memory_space<vmem>>, vector<1x128x128xf32>
    %38 = vector.shape_cast %37 : vector<1x128x128xf32> to vector<128x128xf32>
    %c0_39 = arith.constant 0 : index
    %c0_40 = arith.constant 0 : index
    %39 = vector.load %arg1[%c0_39, %c0_40] : memref<32x128xf32, #tpu.memory_space<vmem>>, vector<32x128xf32>
    %cst_41 = arith.constant dense<0.000000e+00> : vector<32x128xf32>
    %40 = tpu.matmul %39, %28, %cst_41 {dimension_numbers = #tpu.dot_dimension_numbers<[1], [0], [0], [1], [0, 0, 1, 1], [], []>} : vector<32x128xf32>, vector<128x128xf32>, vector<32x128xf32> -> vector<32x128xf32>
    %cst_42 = arith.constant dense<0.000000e+00> : vector<32x128xf32>
    %41 = tpu.matmul %26, %34, %cst_42 {dimension_numbers = #tpu.dot_dimension_numbers<[1], [0], [0], [1], [0, 0, 1, 1], [], []>} : vector<32x128xf32>, vector<128x128xf32>, vector<32x128xf32> -> vector<32x128xf32>
    %42 = arith.addf %40, %41 : vector<32x128xf32>
    %cst_43 = arith.constant dense<0.000000e+00> : vector<32x128xf32>
    %43 = tpu.matmul %1, %42, %cst_43 {dimension_numbers = #tpu.dot_dimension_numbers<[1], [0], [0], [1], [0, 0, 1, 1], [], []>} : vector<32x32xf32>, vector<32x128xf32>, vector<32x128xf32> -> vector<32x128xf32>
    %cst_44 = arith.constant dense<0.000000e+00> : vector<32x128xf32>
    %44 = tpu.matmul %39, %30, %cst_44 {dimension_numbers = #tpu.dot_dimension_numbers<[1], [0], [0], [1], [0, 0, 1, 1], [], []>} : vector<32x128xf32>, vector<128x128xf32>, vector<32x128xf32> -> vector<32x128xf32>
    %cst_45 = arith.constant dense<0.000000e+00> : vector<32x128xf32>
    %45 = tpu.matmul %26, %36, %cst_45 {dimension_numbers = #tpu.dot_dimension_numbers<[1], [0], [0], [1], [0, 0, 1, 1], [], []>} : vector<32x128xf32>, vector<128x128xf32>, vector<32x128xf32> -> vector<32x128xf32>
    %46 = arith.addf %44, %45 : vector<32x128xf32>
    %47 = arith.addf %43, %46 : vector<32x128xf32>
    %cst_46 = arith.constant dense<0.000000e+00> : vector<32x128xf32>
    %48 = tpu.matmul %39, %32, %cst_46 {dimension_numbers = #tpu.dot_dimension_numbers<[1], [0], [0], [1], [0, 0, 1, 1], [], []>} : vector<32x128xf32>, vector<128x128xf32>, vector<32x128xf32> -> vector<32x128xf32>
    %cst_47 = arith.constant dense<0.000000e+00> : vector<32x128xf32>
    %49 = tpu.matmul %26, %38, %cst_47 {dimension_numbers = #tpu.dot_dimension_numbers<[1], [0], [0], [1], [0, 0, 1, 1], [], []>} : vector<32x128xf32>, vector<128x128xf32>, vector<32x128xf32> -> vector<32x128xf32>
    %50 = arith.addf %48, %49 : vector<32x128xf32>
    %cst_48 = arith.constant dense<0.000000e+00> : vector<32x128xf32>
    %51 = tpu.matmul %3, %50, %cst_48 {dimension_numbers = #tpu.dot_dimension_numbers<[1], [0], [0], [1], [0, 0, 1, 1], [], []>} : vector<32x32xf32>, vector<32x128xf32>, vector<32x128xf32> -> vector<32x128xf32>
    %52 = arith.addf %47, %51 : vector<32x128xf32>
    %c2_49 = arith.constant 2 : index
    %c0_50 = arith.constant 0 : index
    %53 = vector.load %arg9[%c2_49, %c0_50] : memref<14x128xf32, #tpu.memory_space<vmem>>, vector<1x128xf32>
    %54 = vector.broadcast %53 : vector<1x128xf32> to vector<32x128xf32>
    %55 = arith.mulf %52, %54 : vector<32x128xf32>
    %c3 = arith.constant 3 : index
    %c0_51 = arith.constant 0 : index
    %56 = vector.load %arg9[%c3, %c0_51] : memref<14x128xf32, #tpu.memory_space<vmem>>, vector<1x128xf32>
    %57 = vector.broadcast %56 : vector<1x128xf32> to vector<32x128xf32>
    %58 = arith.addf %55, %57 : vector<32x128xf32>
    %cst_52 = arith.constant 0.000000e+00 : f32
    %59 = vector.broadcast %cst_52 : f32 to vector<32x128xf32>
    %60 = arith.cmpf ogt, %58, %59 : vector<32x128xf32>
    %cst_53 = arith.constant 1.000000e-01 : f32
    %61 = vector.broadcast %cst_53 : f32 to vector<32x128xf32>
    %62 = arith.mulf %61, %58 : vector<32x128xf32>
    %63 = arith.select %60, %58, %62 : vector<32x128xi1>, vector<32x128xf32>
    %c0_54 = arith.constant 0 : index
    %c0_55 = arith.constant 0 : index
    %c0_56 = arith.constant 0 : index
    %c0_57 = arith.constant 0 : index
    %64 = vector.load %arg8[%c0_54, %c0_55, %c0_56, %c0_57] : memref<4x3x128x128xf32, #tpu.memory_space<vmem>>, vector<1x1x128x128xf32>
    %65 = vector.shape_cast %64 : vector<1x1x128x128xf32> to vector<128x128xf32>
    %c0_58 = arith.constant 0 : index
    %c1_59 = arith.constant 1 : index
    %c0_60 = arith.constant 0 : index
    %c0_61 = arith.constant 0 : index
    %66 = vector.load %arg8[%c0_58, %c1_59, %c0_60, %c0_61] : memref<4x3x128x128xf32, #tpu.memory_space<vmem>>, vector<1x1x128x128xf32>
    %67 = vector.shape_cast %66 : vector<1x1x128x128xf32> to vector<128x128xf32>
    %c0_62 = arith.constant 0 : index
    %c2_63 = arith.constant 2 : index
    %c0_64 = arith.constant 0 : index
    %c0_65 = arith.constant 0 : index
    %68 = vector.load %arg8[%c0_62, %c2_63, %c0_64, %c0_65] : memref<4x3x128x128xf32, #tpu.memory_space<vmem>>, vector<1x1x128x128xf32>
    %69 = vector.shape_cast %68 : vector<1x1x128x128xf32> to vector<128x128xf32>
    %c1_66 = arith.constant 1 : index
    %c0_67 = arith.constant 0 : index
    %c0_68 = arith.constant 0 : index
    %c0_69 = arith.constant 0 : index
    %70 = vector.load %arg8[%c1_66, %c0_67, %c0_68, %c0_69] : memref<4x3x128x128xf32, #tpu.memory_space<vmem>>, vector<1x1x128x128xf32>
    %71 = vector.shape_cast %70 : vector<1x1x128x128xf32> to vector<128x128xf32>
    %c1_70 = arith.constant 1 : index
    %c1_71 = arith.constant 1 : index
    %c0_72 = arith.constant 0 : index
    %c0_73 = arith.constant 0 : index
    %72 = vector.load %arg8[%c1_70, %c1_71, %c0_72, %c0_73] : memref<4x3x128x128xf32, #tpu.memory_space<vmem>>, vector<1x1x128x128xf32>
    %73 = vector.shape_cast %72 : vector<1x1x128x128xf32> to vector<128x128xf32>
    %c1_74 = arith.constant 1 : index
    %c2_75 = arith.constant 2 : index
    %c0_76 = arith.constant 0 : index
    %c0_77 = arith.constant 0 : index
    %74 = vector.load %arg8[%c1_74, %c2_75, %c0_76, %c0_77] : memref<4x3x128x128xf32, #tpu.memory_space<vmem>>, vector<1x1x128x128xf32>
    %75 = vector.shape_cast %74 : vector<1x1x128x128xf32> to vector<128x128xf32>
    %c4 = arith.constant 4 : index
    %c0_78 = arith.constant 0 : index
    %76 = vector.load %arg9[%c4, %c0_78] : memref<14x128xf32, #tpu.memory_space<vmem>>, vector<1x128xf32>
    %77 = vector.broadcast %76 : vector<1x128xf32> to vector<32x128xf32>
    %78 = arith.mulf %63, %77 : vector<32x128xf32>
    %c5 = arith.constant 5 : index
    %c0_79 = arith.constant 0 : index
    %79 = vector.load %arg9[%c5, %c0_79] : memref<14x128xf32, #tpu.memory_space<vmem>>, vector<1x128xf32>
    %80 = vector.broadcast %79 : vector<1x128xf32> to vector<32x128xf32>
    %81 = arith.addf %78, %80 : vector<32x128xf32>
    %cst_80 = arith.constant 0.000000e+00 : f32
    %82 = vector.broadcast %cst_80 : f32 to vector<32x128xf32>
    %83 = arith.cmpf ogt, %81, %82 : vector<32x128xf32>
    %cst_81 = arith.constant 1.000000e-01 : f32
    %84 = vector.broadcast %cst_81 : f32 to vector<32x128xf32>
    %85 = arith.mulf %84, %81 : vector<32x128xf32>
    %86 = arith.select %83, %81, %85 : vector<32x128xi1>, vector<32x128xf32>
    %cst_82 = arith.constant dense<0.000000e+00> : vector<32x128xf32>
    %87 = tpu.matmul %86, %65, %cst_82 {dimension_numbers = #tpu.dot_dimension_numbers<[1], [0], [0], [1], [0, 0, 1, 1], [], []>} : vector<32x128xf32>, vector<128x128xf32>, vector<32x128xf32> -> vector<32x128xf32>
    %cst_83 = arith.constant dense<0.000000e+00> : vector<32x128xf32>
    %88 = tpu.matmul %1, %87, %cst_83 {dimension_numbers = #tpu.dot_dimension_numbers<[1], [0], [0], [1], [0, 0, 1, 1], [], []>} : vector<32x32xf32>, vector<32x128xf32>, vector<32x128xf32> -> vector<32x128xf32>
    %cst_84 = arith.constant dense<0.000000e+00> : vector<32x128xf32>
    %89 = tpu.matmul %86, %67, %cst_84 {dimension_numbers = #tpu.dot_dimension_numbers<[1], [0], [0], [1], [0, 0, 1, 1], [], []>} : vector<32x128xf32>, vector<128x128xf32>, vector<32x128xf32> -> vector<32x128xf32>
    %90 = arith.addf %88, %89 : vector<32x128xf32>
    %cst_85 = arith.constant dense<0.000000e+00> : vector<32x128xf32>
    %91 = tpu.matmul %86, %69, %cst_85 {dimension_numbers = #tpu.dot_dimension_numbers<[1], [0], [0], [1], [0, 0, 1, 1], [], []>} : vector<32x128xf32>, vector<128x128xf32>, vector<32x128xf32> -> vector<32x128xf32>
    %cst_86 = arith.constant dense<0.000000e+00> : vector<32x128xf32>
    %92 = tpu.matmul %3, %91, %cst_86 {dimension_numbers = #tpu.dot_dimension_numbers<[1], [0], [0], [1], [0, 0, 1, 1], [], []>} : vector<32x32xf32>, vector<32x128xf32>, vector<32x128xf32> -> vector<32x128xf32>
    %93 = arith.addf %90, %92 : vector<32x128xf32>
    %c6 = arith.constant 6 : index
    %c0_87 = arith.constant 0 : index
    %94 = vector.load %arg9[%c6, %c0_87] : memref<14x128xf32, #tpu.memory_space<vmem>>, vector<1x128xf32>
    %95 = vector.broadcast %94 : vector<1x128xf32> to vector<32x128xf32>
    %96 = arith.mulf %93, %95 : vector<32x128xf32>
    %c7 = arith.constant 7 : index
    %c0_88 = arith.constant 0 : index
    %97 = vector.load %arg9[%c7, %c0_88] : memref<14x128xf32, #tpu.memory_space<vmem>>, vector<1x128xf32>
    %98 = vector.broadcast %97 : vector<1x128xf32> to vector<32x128xf32>
    %99 = arith.addf %96, %98 : vector<32x128xf32>
    %cst_89 = arith.constant 0.000000e+00 : f32
    %100 = vector.broadcast %cst_89 : f32 to vector<32x128xf32>
    %101 = arith.cmpf ogt, %99, %100 : vector<32x128xf32>
    %cst_90 = arith.constant 1.000000e-01 : f32
    %102 = vector.broadcast %cst_90 : f32 to vector<32x128xf32>
    %103 = arith.mulf %102, %99 : vector<32x128xf32>
    %104 = arith.select %101, %99, %103 : vector<32x128xi1>, vector<32x128xf32>
    %cst_91 = arith.constant dense<0.000000e+00> : vector<32x128xf32>
    %105 = tpu.matmul %104, %71, %cst_91 {dimension_numbers = #tpu.dot_dimension_numbers<[1], [0], [0], [1], [0, 0, 1, 1], [], []>} : vector<32x128xf32>, vector<128x128xf32>, vector<32x128xf32> -> vector<32x128xf32>
    %cst_92 = arith.constant dense<0.000000e+00> : vector<32x128xf32>
    %106 = tpu.matmul %1, %105, %cst_92 {dimension_numbers = #tpu.dot_dimension_numbers<[1], [0], [0], [1], [0, 0, 1, 1], [], []>} : vector<32x32xf32>, vector<32x128xf32>, vector<32x128xf32> -> vector<32x128xf32>
    %cst_93 = arith.constant dense<0.000000e+00> : vector<32x128xf32>
    %107 = tpu.matmul %104, %73, %cst_93 {dimension_numbers = #tpu.dot_dimension_numbers<[1], [0], [0], [1], [0, 0, 1, 1], [], []>} : vector<32x128xf32>, vector<128x128xf32>, vector<32x128xf32> -> vector<32x128xf32>
    %108 = arith.addf %106, %107 : vector<32x128xf32>
    %cst_94 = arith.constant dense<0.000000e+00> : vector<32x128xf32>
    %109 = tpu.matmul %104, %75, %cst_94 {dimension_numbers = #tpu.dot_dimension_numbers<[1], [0], [0], [1], [0, 0, 1, 1], [], []>} : vector<32x128xf32>, vector<128x128xf32>, vector<32x128xf32> -> vector<32x128xf32>
    %cst_95 = arith.constant dense<0.000000e+00> : vector<32x128xf32>
    %110 = tpu.matmul %3, %109, %cst_95 {dimension_numbers = #tpu.dot_dimension_numbers<[1], [0], [0], [1], [0, 0, 1, 1], [], []>} : vector<32x32xf32>, vector<32x128xf32>, vector<32x128xf32> -> vector<32x128xf32>
    %111 = arith.addf %108, %110 : vector<32x128xf32>
    %112 = arith.addf %63, %111 : vector<32x128xf32>
    %c8 = arith.constant 8 : index
    %c0_96 = arith.constant 0 : index
    %113 = vector.load %arg9[%c8, %c0_96] : memref<14x128xf32, #tpu.memory_space<vmem>>, vector<1x128xf32>
    %114 = vector.broadcast %113 : vector<1x128xf32> to vector<32x128xf32>
    %115 = arith.addf %112, %114 : vector<32x128xf32>
    %c2_97 = arith.constant 2 : index
    %c0_98 = arith.constant 0 : index
    %c0_99 = arith.constant 0 : index
    %c0_100 = arith.constant 0 : index
    %116 = vector.load %arg8[%c2_97, %c0_98, %c0_99, %c0_100] : memref<4x3x128x128xf32, #tpu.memory_space<vmem>>, vector<1x1x128x128xf32>
    %117 = vector.shape_cast %116 : vector<1x1x128x128xf32> to vector<128x128xf32>
    %c2_101 = arith.constant 2 : index
    %c1_102 = arith.constant 1 : index
    %c0_103 = arith.constant 0 : index
    %c0_104 = arith.constant 0 : index
    %118 = vector.load %arg8[%c2_101, %c1_102, %c0_103, %c0_104] : memref<4x3x128x128xf32, #tpu.memory_space<vmem>>, vector<1x1x128x128xf32>
    %119 = vector.shape_cast %118 : vector<1x1x128x128xf32> to vector<128x128xf32>
    %c2_105 = arith.constant 2 : index
    %c2_106 = arith.constant 2 : index
    %c0_107 = arith.constant 0 : index
    %c0_108 = arith.constant 0 : index
    %120 = vector.load %arg8[%c2_105, %c2_106, %c0_107, %c0_108] : memref<4x3x128x128xf32, #tpu.memory_space<vmem>>, vector<1x1x128x128xf32>
    %121 = vector.shape_cast %120 : vector<1x1x128x128xf32> to vector<128x128xf32>
    %c3_109 = arith.constant 3 : index
    %c0_110 = arith.constant 0 : index
    %c0_111 = arith.constant 0 : index
    %c0_112 = arith.constant 0 : index
    %122 = vector.load %arg8[%c3_109, %c0_110, %c0_111, %c0_112] : memref<4x3x128x128xf32, #tpu.memory_space<vmem>>, vector<1x1x128x128xf32>
    %123 = vector.shape_cast %122 : vector<1x1x128x128xf32> to vector<128x128xf32>
    %c3_113 = arith.constant 3 : index
    %c1_114 = arith.constant 1 : index
    %c0_115 = arith.constant 0 : index
    %c0_116 = arith.constant 0 : index
    %124 = vector.load %arg8[%c3_113, %c1_114, %c0_115, %c0_116] : memref<4x3x128x128xf32, #tpu.memory_space<vmem>>, vector<1x1x128x128xf32>
    %125 = vector.shape_cast %124 : vector<1x1x128x128xf32> to vector<128x128xf32>
    %c3_117 = arith.constant 3 : index
    %c2_118 = arith.constant 2 : index
    %c0_119 = arith.constant 0 : index
    %c0_120 = arith.constant 0 : index
    %126 = vector.load %arg8[%c3_117, %c2_118, %c0_119, %c0_120] : memref<4x3x128x128xf32, #tpu.memory_space<vmem>>, vector<1x1x128x128xf32>
    %127 = vector.shape_cast %126 : vector<1x1x128x128xf32> to vector<128x128xf32>
    %c9 = arith.constant 9 : index
    %c0_121 = arith.constant 0 : index
    %128 = vector.load %arg9[%c9, %c0_121] : memref<14x128xf32, #tpu.memory_space<vmem>>, vector<1x128xf32>
    %129 = vector.broadcast %128 : vector<1x128xf32> to vector<32x128xf32>
    %130 = arith.mulf %115, %129 : vector<32x128xf32>
    %c10 = arith.constant 10 : index
    %c0_122 = arith.constant 0 : index
    %131 = vector.load %arg9[%c10, %c0_122] : memref<14x128xf32, #tpu.memory_space<vmem>>, vector<1x128xf32>
    %132 = vector.broadcast %131 : vector<1x128xf32> to vector<32x128xf32>
    %133 = arith.addf %130, %132 : vector<32x128xf32>
    %cst_123 = arith.constant 0.000000e+00 : f32
    %134 = vector.broadcast %cst_123 : f32 to vector<32x128xf32>
    %135 = arith.cmpf ogt, %133, %134 : vector<32x128xf32>
    %cst_124 = arith.constant 1.000000e-01 : f32
    %136 = vector.broadcast %cst_124 : f32 to vector<32x128xf32>
    %137 = arith.mulf %136, %133 : vector<32x128xf32>
    %138 = arith.select %135, %133, %137 : vector<32x128xi1>, vector<32x128xf32>
    %cst_125 = arith.constant dense<0.000000e+00> : vector<32x128xf32>
    %139 = tpu.matmul %138, %117, %cst_125 {dimension_numbers = #tpu.dot_dimension_numbers<[1], [0], [0], [1], [0, 0, 1, 1], [], []>} : vector<32x128xf32>, vector<128x128xf32>, vector<32x128xf32> -> vector<32x128xf32>
    %cst_126 = arith.constant dense<0.000000e+00> : vector<32x128xf32>
    %140 = tpu.matmul %1, %139, %cst_126 {dimension_numbers = #tpu.dot_dimension_numbers<[1], [0], [0], [1], [0, 0, 1, 1], [], []>} : vector<32x32xf32>, vector<32x128xf32>, vector<32x128xf32> -> vector<32x128xf32>
    %cst_127 = arith.constant dense<0.000000e+00> : vector<32x128xf32>
    %141 = tpu.matmul %138, %119, %cst_127 {dimension_numbers = #tpu.dot_dimension_numbers<[1], [0], [0], [1], [0, 0, 1, 1], [], []>} : vector<32x128xf32>, vector<128x128xf32>, vector<32x128xf32> -> vector<32x128xf32>
    %142 = arith.addf %140, %141 : vector<32x128xf32>
    %cst_128 = arith.constant dense<0.000000e+00> : vector<32x128xf32>
    %143 = tpu.matmul %138, %121, %cst_128 {dimension_numbers = #tpu.dot_dimension_numbers<[1], [0], [0], [1], [0, 0, 1, 1], [], []>} : vector<32x128xf32>, vector<128x128xf32>, vector<32x128xf32> -> vector<32x128xf32>
    %cst_129 = arith.constant dense<0.000000e+00> : vector<32x128xf32>
    %144 = tpu.matmul %3, %143, %cst_129 {dimension_numbers = #tpu.dot_dimension_numbers<[1], [0], [0], [1], [0, 0, 1, 1], [], []>} : vector<32x32xf32>, vector<32x128xf32>, vector<32x128xf32> -> vector<32x128xf32>
    %145 = arith.addf %142, %144 : vector<32x128xf32>
    %c11 = arith.constant 11 : index
    %c0_130 = arith.constant 0 : index
    %146 = vector.load %arg9[%c11, %c0_130] : memref<14x128xf32, #tpu.memory_space<vmem>>, vector<1x128xf32>
    %147 = vector.broadcast %146 : vector<1x128xf32> to vector<32x128xf32>
    %148 = arith.mulf %145, %147 : vector<32x128xf32>
    %c12 = arith.constant 12 : index
    %c0_131 = arith.constant 0 : index
    %149 = vector.load %arg9[%c12, %c0_131] : memref<14x128xf32, #tpu.memory_space<vmem>>, vector<1x128xf32>
    %150 = vector.broadcast %149 : vector<1x128xf32> to vector<32x128xf32>
    %151 = arith.addf %148, %150 : vector<32x128xf32>
    %cst_132 = arith.constant 0.000000e+00 : f32
    %152 = vector.broadcast %cst_132 : f32 to vector<32x128xf32>
    %153 = arith.cmpf ogt, %151, %152 : vector<32x128xf32>
    %cst_133 = arith.constant 1.000000e-01 : f32
    %154 = vector.broadcast %cst_133 : f32 to vector<32x128xf32>
    %155 = arith.mulf %154, %151 : vector<32x128xf32>
    %156 = arith.select %153, %151, %155 : vector<32x128xi1>, vector<32x128xf32>
    %cst_134 = arith.constant dense<0.000000e+00> : vector<32x128xf32>
    %157 = tpu.matmul %156, %123, %cst_134 {dimension_numbers = #tpu.dot_dimension_numbers<[1], [0], [0], [1], [0, 0, 1, 1], [], []>} : vector<32x128xf32>, vector<128x128xf32>, vector<32x128xf32> -> vector<32x128xf32>
    %cst_135 = arith.constant dense<0.000000e+00> : vector<32x128xf32>
    %158 = tpu.matmul %1, %157, %cst_135 {dimension_numbers = #tpu.dot_dimension_numbers<[1], [0], [0], [1], [0, 0, 1, 1], [], []>} : vector<32x32xf32>, vector<32x128xf32>, vector<32x128xf32> -> vector<32x128xf32>
    %cst_136 = arith.constant dense<0.000000e+00> : vector<32x128xf32>
    %159 = tpu.matmul %156, %125, %cst_136 {dimension_numbers = #tpu.dot_dimension_numbers<[1], [0], [0], [1], [0, 0, 1, 1], [], []>} : vector<32x128xf32>, vector<128x128xf32>, vector<32x128xf32> -> vector<32x128xf32>
    %160 = arith.addf %158, %159 : vector<32x128xf32>
    %cst_137 = arith.constant dense<0.000000e+00> : vector<32x128xf32>
    %161 = tpu.matmul %156, %127, %cst_137 {dimension_numbers = #tpu.dot_dimension_numbers<[1], [0], [0], [1], [0, 0, 1, 1], [], []>} : vector<32x128xf32>, vector<128x128xf32>, vector<32x128xf32> -> vector<32x128xf32>
    %cst_138 = arith.constant dense<0.000000e+00> : vector<32x128xf32>
    %162 = tpu.matmul %3, %161, %cst_138 {dimension_numbers = #tpu.dot_dimension_numbers<[1], [0], [0], [1], [0, 0, 1, 1], [], []>} : vector<32x32xf32>, vector<32x128xf32>, vector<32x128xf32> -> vector<32x128xf32>
    %163 = arith.addf %160, %162 : vector<32x128xf32>
    %164 = arith.addf %115, %163 : vector<32x128xf32>
    %c13 = arith.constant 13 : index
    %c0_139 = arith.constant 0 : index
    %165 = vector.load %arg9[%c13, %c0_139] : memref<14x128xf32, #tpu.memory_space<vmem>>, vector<1x128xf32>
    %166 = vector.broadcast %165 : vector<1x128xf32> to vector<32x128xf32>
    %167 = arith.addf %164, %166 : vector<32x128xf32>
    %c0_140 = arith.constant 0 : index
    %c0_141 = arith.constant 0 : index
    %168 = vector.load %arg10[%c0_140, %c0_141] : memref<32x128xf32, #tpu.memory_space<vmem>>, vector<32x128xf32>
    tpu.vector_store %arg10[%c0_140, %c0_141], %167 {strides = array<i32>} : memref<32x128xf32, #tpu.memory_space<vmem>>, vector<32x128xf32>,
    return
  }
  func.func @transform_0(%arg0: i32) -> (i32, i32) {
    %c0_i32 = arith.constant 0 : i32
    %c0_i32_0 = arith.constant 0 : i32
    return %arg0, %c0_i32 : i32, i32
  }
  func.func @transform_1(%arg0: i32) -> (i32, i32) {
    %c0_i32 = arith.constant 0 : i32
    %c0_i32_0 = arith.constant 0 : i32
    return %arg0, %c0_i32 : i32, i32
  }
  func.func @transform_2(%arg0: i32) -> (i32, i32, i32) {
    %c0_i32 = arith.constant 0 : i32
    %c0_i32_0 = arith.constant 0 : i32
    %c0_i32_1 = arith.constant 0 : i32
    %c0_i32_2 = arith.constant 0 : i32
    return %c0_i32, %c0_i32_0, %c0_i32_1 : i32, i32, i32
  }
  func.func @transform_3(%arg0: i32) -> (i32, i32, i32) {
    %c0_i32 = arith.constant 0 : i32
    %c0_i32_0 = arith.constant 0 : i32
    %c0_i32_1 = arith.constant 0 : i32
    %c0_i32_2 = arith.constant 0 : i32
    return %c0_i32, %c0_i32_0, %c0_i32_1 : i32, i32, i32
  }
  func.func @transform_4(%arg0: i32) -> (i32, i32) {
    %c0_i32 = arith.constant 0 : i32
    %c0_i32_0 = arith.constant 0 : i32
    %c0_i32_1 = arith.constant 0 : i32
    return %c0_i32, %c0_i32_0 : i32, i32
  }
  func.func @transform_5(%arg0: i32) -> (i32, i32, i32) {
    %c0_i32 = arith.constant 0 : i32
    %c0_i32_0 = arith.constant 0 : i32
    %c0_i32_1 = arith.constant 0 : i32
    %c0_i32_2 = arith.constant 0 : i32
    return %c0_i32, %c0_i32_0, %c0_i32_1 : i32, i32, i32
  }
  func.func @transform_6(%arg0: i32) -> (i32, i32, i32) {
    %c0_i32 = arith.constant 0 : i32
    %c0_i32_0 = arith.constant 0 : i32
    %c0_i32_1 = arith.constant 0 : i32
    %c0_i32_2 = arith.constant 0 : i32
    return %c0_i32, %c0_i32_0, %c0_i32_1 : i32, i32, i32
  }
  func.func @transform_7(%arg0: i32) -> (i32, i32, i32, i32) {
    %c0_i32 = arith.constant 0 : i32
    %c0_i32_0 = arith.constant 0 : i32
    %c0_i32_1 = arith.constant 0 : i32
    %c0_i32_2 = arith.constant 0 : i32
    %c0_i32_3 = arith.constant 0 : i32
    return %c0_i32, %c0_i32_0, %c0_i32_1, %c0_i32_2 : i32, i32, i32, i32
  }
  func.func @transform_8(%arg0: i32) -> (i32, i32) {
    %c0_i32 = arith.constant 0 : i32
    %c0_i32_0 = arith.constant 0 : i32
    %c0_i32_1 = arith.constant 0 : i32
    return %c0_i32, %c0_i32_0 : i32, i32
  }
  func.func @transform_9(%arg0: i32) -> (i32, i32) {
    %c0_i32 = arith.constant 0 : i32
    %c0_i32_0 = arith.constant 0 : i32
    return %arg0, %c0_i32 : i32, i32
  }
}

</mosaic_0001>

<bundles_post_ra>
// kernel: fwd.1
= control target key start
LH: loop header
LB: loop body
LE: loop exit
PB: predicated region body
PF: predicated region fallthrough
CT: control target
= control target key end

     0   :  { %14 = vsyncpa [#allocation3], 0  ;;  %s1769_s12 = smov [#allocation2]   ;;  %s1770_s14 = smov 128   ;;  %s2540_s0 = inlined_call_operand.vmem [shape: f32[32,128], index: 0, kind: input, shape index: {}]   ;;  %s2541_s1 = inlined_call_operand.vmem [shape: f32[16,128], index: 1, kind: input, shape index: {}]   ;;  %s2542_s2 = inlined_call_operand.vmem [shape: f32[2,32,32], index: 2, kind: input, shape index: {}]   ;;  %s2543_s3 = inlined_call_operand.vmem [shape: f32[2,32,16], index: 3, kind: input, shape index: {}]   ;;  %s2544_s4 = inlined_call_operand.vmem [shape: f32[128,256], index: 4, kind: input, shape index: {}]   ;;  %s2545_s5 = inlined_call_operand.vmem [shape: f32[3,128,128], index: 5, kind: input, shape index: {}]   ;;  %s2546_s6 = inlined_call_operand.vmem [shape: f32[3,128,128], index: 6, kind: input, shape index: {}]   ;;  %s2547_s7 = inlined_call_operand.hbm [shape: f32[4,3,128,128], index: 7, kind: input, shape index: {}]   ;;  %s2548_s8 = inlined_call_operand.vmem [shape: f32[14,128], index: 8, kind: input, shape index: {}]   ;;  %s2549_s9 = inlined_call_operand.vmem [shape: f32[32,128], index: 9, kind: output, shape index: {}]  }
   0x1   :  { %s33_s11 = sshll.u32 %s2547_s7, 4  ;;  %s35_s13 = sshll.u32 %s1769_s12, 4  ;;  %s34_s11 = int_to_ptr.hbm [resolvable:$true] %s33_s11  ;;  %s36_s13 = int_to_ptr.vmem [resolvable:$true] %s35_s13 }
   0x2   :  { %s1771_s15 = smov 8  }
   0x3   :  { %41 = dma.hbm_to_vmem [thread:$0]  %s34_s11, 24576, %s36_s13, [#allocation3], %s1770_s14, %s1770_s14, %s1771_s15  }
   0x4   :  { %1767 = dma.done.wait [#allocation3], 24576  }
   0x5   :  { %1768 = vsyncadd [#allocation3], 4294942720  ;;  %v89_v0 = vld [vmem:[%s2544_s4 + $0xf0] sm:$0xff]  ;;  %v90_v1 = vld [vmem:[%s2544_s4 + $0xf8] sm:$0xff]  ;;  %vm146_vm0 = vcmask 130048   ;;  %vm473_vm5 = vcmask 261120  }
   0x6   :  { %v87_v2 = vld [vmem:[%s2544_s4 + $0xe0] sm:$0xff]  ;;  %91 = vmatpush.msra.mxu0 %v89_v0  ;;  %114 = vmatpush.msra.mxu1 %v90_v1  ;;  %v88_v3 = vld [vmem:[%s2544_s4 + $0xe8] sm:$0xff]  ;;  %v85_v4 = vld [vmem:[%s2544_s4 + $0xd0] sm:$0xff] }
   0x7   :  { %v86_v5 = vld [vmem:[%s2544_s4 + $0xd8] sm:$0xff]  ;;  %v83_v6 = vld [vmem:[%s2544_s4 + $0xc0] sm:$0xff]  ;;  %v84_v7 = vld [vmem:[%s2544_s4 + $0xc8] sm:$0xff] }
   0x8   :  { %92 = vmatpush.msra.mxu0 %v87_v2  ;;  %115 = vmatpush.msra.mxu1 %v88_v3  ;;  %v81_v8 = vld [vmem:[%s2544_s4 + $0xb0] sm:$0xff]  ;;  %v82_v9 = vld [vmem:[%s2544_s4 + $0xb8] sm:$0xff]  ;;  %v79_v10 = vld [vmem:[%s2544_s4 + $0xa0] sm:$0xff] }
   0x9   :  { %v80_v11 = vld [vmem:[%s2544_s4 + $0xa8] sm:$0xff]  ;;  %v77_v12 = vld [vmem:[%s2544_s4 + $0x90] sm:$0xff]  ;;  %v78_v13 = vld [vmem:[%s2544_s4 + $0x98] sm:$0xff] }
   0xa   :  { %93 = vmatpush.msra.mxu0 %v85_v4  ;;  %116 = vmatpush.msra.mxu1 %v86_v5  ;;  %v75_v14 = vld [vmem:[%s2544_s4 + $0x80] sm:$0xff]  ;;  %v76_v15 = vld [vmem:[%s2544_s4 + $0x88] sm:$0xff]  ;;  %v73_v16 = vld [vmem:[%s2544_s4 + $0x70] sm:$0xff] }
   0xb   :  { %v74_v17 = vld [vmem:[%s2544_s4 + $0x78] sm:$0xff]  ;;  %v71_v18 = vld [vmem:[%s2544_s4 + $0x60] sm:$0xff]  ;;  %v72_v19 = vld [vmem:[%s2544_s4 + $0x68] sm:$0xff] }
   0xc   :  { %94 = vmatpush.msra.mxu0 %v83_v6  ;;  %117 = vmatpush.msra.mxu1 %v84_v7  ;;  %v69_v20 = vld [vmem:[%s2544_s4 + $0x50] sm:$0xff]  ;;  %v70_v21 = vld [vmem:[%s2544_s4 + $0x58] sm:$0xff]  ;;  %v67_v22 = vld [vmem:[%s2544_s4 + $0x40] sm:$0xff] }
   0xd   :  { %v68_v23 = vld [vmem:[%s2544_s4 + $0x48] sm:$0xff]  ;;  %v65_v24 = vld [vmem:[%s2544_s4 + $0x30] sm:$0xff]  ;;  %v66_v25 = vld [vmem:[%s2544_s4 + $0x38] sm:$0xff] }
   0xe   :  { %95 = vmatpush.msra.mxu0 %v81_v8  ;;  %118 = vmatpush.msra.mxu1 %v82_v9  ;;  %v63_v26 = vld [vmem:[%s2544_s4 + $0x20] sm:$0xff]  ;;  %v64_v27 = vld [vmem:[%s2544_s4 + $0x28] sm:$0xff]  ;;  %v61_v28 = vld [vmem:[%s2544_s4 + $0x10] sm:$0xff] }
   0xf   :  { %v62_v29 = vld [vmem:[%s2544_s4 + $0x18] sm:$0xff]  ;;  %v59_v30 = vld [vmem:[%s2544_s4] sm:$0xff]  ;;  %v60_v31 = vld [vmem:[%s2544_s4 + $0x8] sm:$0xff] }
  0x10   :  { %96 = vmatpush.msra.mxu0 %v79_v10  ;;  %119 = vmatpush.msra.mxu1 %v80_v11  ;;  %v57_v32 = vld [vmem:[%s2541_s1] sm:$0xff]  ;;  %v58_v33 = vld [vmem:[%s2541_s1 + $0x8] sm:$0xff]  ;;  %v268_v40 = vld [vmem:[%s2545_s5 + $0x78] sm:$0xff] }
  0x11   :  { %v1570_v38 = vld [vmem:[%s2543_s3 + $0x20] sm:$0xff]  ;;  %v267_v41 = vld [vmem:[%s2545_s5 + $0x70] sm:$0xff]  ;;  %v318_v42 = vld [vmem:[%s2546_s6 + $0x78] sm:$0xff] }
  0x12   :  { %97 = vmatpush.msra.mxu0 %v77_v12  ;;  %120 = vmatpush.msra.mxu1 %v78_v13  ;;  %v137_v39 = vld [vmem:[%s2543_s3] sm:$0xff]  ;;  %v1629_v43 = vld [vmem:[%s2546_s6 + $0xf8] sm:$0xff]  ;;  %v317_v45 = vld [vmem:[%s2546_s6 + $0x70] sm:$0xff] }
  0x13   :  { %v1597_v44 = vld [vmem:[%s2545_s5 + $0xf8] sm:$0xff]  ;;  %v1628_v46 = vld [vmem:[%s2546_s6 + $0xf0] sm:$0xff]  ;;  %v266_v47 = vld [vmem:[%s2545_s5 + $0x68] sm:$0xff] }
  0x14   :  { %98 = vmatpush.msra.mxu0 %v75_v14  ;;  %121 = vmatpush.msra.mxu1 %v76_v15  ;;  %v1596_v48 = vld [vmem:[%s2545_s5 + $0xf0] sm:$0xff]  ;;  %v316_v49 = vld [vmem:[%s2546_s6 + $0x68] sm:$0xff]  ;;  %v265_v52 = vld [vmem:[%s2545_s5 + $0x60] sm:$0xff] }
  0x15   :  { %v1627_v50 = vld [vmem:[%s2546_s6 + $0xe8] sm:$0xff]  ;;  %v315_v55 = vld [vmem:[%s2546_s6 + $0x60] sm:$0xff]  ;;  %v264_v56 = vld [vmem:[%s2545_s5 + $0x58] sm:$0xff] }
  0x16   :  { %99 = vmatpush.msra.mxu0 %v73_v16  ;;  %122 = vmatpush.msra.mxu1 %v74_v17  ;;  %v1595_v51 = vld [vmem:[%s2545_s5 + $0xe8] sm:$0xff]  ;;  %v1626_v57 = vld [vmem:[%s2546_s6 + $0xe0] sm:$0xff]  ;;  %v263_v59 = vld [vmem:[%s2545_s5 + $0x50] sm:$0xff] }
  0x17   :  { %v1571_v53 = vld [vmem:[%s2543_s3 + $0x28] sm:$0xff]  ;;  %v1594_v58 = vld [vmem:[%s2545_s5 + $0xe0] sm:$0xff]  ;;  %v314_v60 = vld [vmem:[%s2546_s6 + $0x58] sm:$0xff] }
  0x18   :  { %100 = vmatpush.msra.mxu0 %v71_v18  ;;  %123 = vmatpush.msra.mxu1 %v72_v19  ;;  %v138_v54 = vld [vmem:[%s2543_s3 + $0x8] sm:$0xff]  ;;  %v1625_v61 = vld [vmem:[%s2546_s6 + $0xd8] sm:$0xff]  ;;  %v313_v63 = vld [vmem:[%s2546_s6 + $0x50] sm:$0xff] }
  0x19   :  { %v1593_v62 = vld [vmem:[%s2545_s5 + $0xd8] sm:$0xff]  ;;  %v262_v0 = vld [vmem:[%s2545_s5 + $0x48] sm:$0xff]  ;;  %v1624_v1 = vld [vmem:[%s2546_s6 + $0xd0] sm:$0xff] }
  0x1a   :  { %101 = vmatpush.msra.mxu0 %v69_v20  ;;  %124 = vmatpush.msra.mxu1 %v70_v21  ;;  %v1592_v2 = vld [vmem:[%s2545_s5 + $0xd0] sm:$0xff]  ;;  %v312_v3 = vld [vmem:[%s2546_s6 + $0x48] sm:$0xff]  ;;  %v261_v4 = vld [vmem:[%s2545_s5 + $0x40] sm:$0xff] }
  0x1b   :  { %v1623_v5 = vld [vmem:[%s2546_s6 + $0xc8] sm:$0xff]  ;;  %v1572_v6 = vld [vmem:[%s2543_s3 + $0x30] sm:$0xff]  ;;  %v260_v8 = vld [vmem:[%s2545_s5 + $0x38] sm:$0xff] }
  0x1c   :  { %102 = vmatpush.msra.mxu0 %v67_v22  ;;  %125 = vmatpush.msra.mxu1 %v68_v23  ;;  %v139_v7 = vld [vmem:[%s2543_s3 + $0x10] sm:$0xff]  ;;  %v1591_v9 = vld [vmem:[%s2545_s5 + $0xc8] sm:$0xff]  ;;  %v311_v10 = vld [vmem:[%s2546_s6 + $0x40] sm:$0xff] }
  0x1d   :  { %v1622_v11 = vld [vmem:[%s2546_s6 + $0xc0] sm:$0xff]  ;;  %v259_v12 = vld [vmem:[%s2545_s5 + $0x30] sm:$0xff]  ;;  %v310_v14 = vld [vmem:[%s2546_s6 + $0x38] sm:$0xff] }
  0x1e   :  { %103 = vmatpush.msra.mxu0 %v65_v24  ;;  %126 = vmatpush.msra.mxu1 %v66_v25  ;;  %v1590_v13 = vld [vmem:[%s2545_s5 + $0xc0] sm:$0xff]  ;;  %v1621_v15 = vld [vmem:[%s2546_s6 + $0xb8] sm:$0xff]  ;;  %v258_v16 = vld [vmem:[%s2545_s5 + $0x28] sm:$0xff] }
  0x1f   :  { %v1589_v17 = vld [vmem:[%s2545_s5 + $0xb8] sm:$0xff]  ;;  %v309_v18 = vld [vmem:[%s2546_s6 + $0x30] sm:$0xff]  ;;  %v257_v20 = vld [vmem:[%s2545_s5 + $0x20] sm:$0xff] }
  0x20   :  { %104 = vmatpush.msra.mxu0 %v63_v26  ;;  %127 = vmatpush.msra.mxu1 %v64_v27  ;;  %v1620_v19 = vld [vmem:[%s2546_s6 + $0xb0] sm:$0xff]  ;;  %v1573_v22 = vld [vmem:[%s2543_s3 + $0x38] sm:$0xff]  ;;  %v308_v25 = vld [vmem:[%s2546_s6 + $0x28] sm:$0xff] }
  0x21   :  { %v1588_v21 = vld [vmem:[%s2545_s5 + $0xb0] sm:$0xff]  ;;  %v140_v23 = vld [vmem:[%s2543_s3 + $0x18] sm:$0xff]  ;;  %v1619_v26 = vld [vmem:[%s2546_s6 + $0xa8] sm:$0xff] }
  0x22   :  { %105 = vmatpush.msra.mxu0 %v61_v28  ;;  %128 = vmatpush.msra.mxu1 %v62_v29  ;;  %v256_v24 = vld [vmem:[%s2545_s5 + $0x18] sm:$0xff]  ;;  %v1587_v27 = vld [vmem:[%s2545_s5 + $0xa8] sm:$0xff]  ;;  %v255_v28 = vld [vmem:[%s2545_s5 + $0x10] sm:$0xff] }
  0x23   :  { %v254_v29 = vld [vmem:[%s2545_s5 + $0x8] sm:$0xff] }
  0x24   :  { %106 = vmatpush.msra.mxu0 %v59_v30  ;;  %129 = vmatpush.msra.mxu1 %v60_v31  ;;  %v253_v30 = vld [vmem:[%s2545_s5] sm:$0xff] }
  0x25   :  { %107 = vmatmul.f32.vlgmr.msra.gmra.mxu0 %v57_v32  ;;  %130 = vmatmul.f32.vlgmr.msra.gmra.mxu1 %v57_v32  ;;  %v2109_v31 = vld [vmem:[%s2540_s0] sm:$0xff]  ;;  %v1645_v32 = vld [vmem:[%s2546_s6 + $0x178] sm:$0xff] }
  0x26   :  { %415 = vmatpush.msrb.mxu0 %v1629_v43  ;;  %444 = vmatpush.msrb.mxu1 %v1597_v44  ;;  %v1636_v43 = vld [vmem:[%s2546_s6 + $0x130] sm:$0xff]  ;;  %v1635_v44 = vld [vmem:[%s2546_s6 + $0x128] sm:$0xff] }
  0x28   :  { %416 = vmatpush.msrb.mxu0 %v1628_v46  ;;  %445 = vmatpush.msrb.mxu1 %v1596_v48  ;;  %v1618_v46 = vld [vmem:[%s2546_s6 + $0xa0] sm:$0xff] }
  0x29   :  { %v1634_v48 = vld [vmem:[%s2546_s6 + $0x120] sm:$0xff] }
  0x2a   :  { %417 = vmatpush.msrb.mxu0 %v1627_v50  ;;  %446 = vmatpush.msrb.mxu1 %v1595_v51  ;;  %v306_v50 = vld [vmem:[%s2546_s6 + $0x18] sm:$0xff] }
  0x2b   :  { %v1617_v51 = vld [vmem:[%s2546_s6 + $0x98] sm:$0xff] }
  0x2c   :  { %418 = vmatpush.msrb.mxu0 %v1626_v57  ;;  %447 = vmatpush.msrb.mxu1 %v1594_v58  ;;  %v1632_v57 = vld [vmem:[%s2546_s6 + $0x110] sm:$0xff]  ;;  %v304_v58 = vld [vmem:[%s2546_s6 + $0x8] sm:$0xff] }
  0x2d   :  { %110 = vmatmul.f32.gmra.mxu0 %v58_v33  ;;  %133 = vmatmul.f32.gmra.mxu1 %v58_v33  ;;  %v1644_v33 = vld [vmem:[%s2546_s6 + $0x170] sm:$0xff] }
  0x2e   :  { %419 = vmatpush.msrb.mxu0 %v1625_v61  ;;  %448 = vmatpush.msrb.mxu1 %v1593_v62  ;;  %v1631_v61 = vld [vmem:[%s2546_s6 + $0x108] sm:$0xff]  ;;  %v303_v62 = vld [vmem:[%s2546_s6] sm:$0xff] }
  0x30   :  { %420 = vmatpush.msrb.mxu0 %v1624_v1  ;;  %449 = vmatpush.msrb.mxu1 %v1592_v2  ;;  %v1630_v1 = vld [vmem:[%s2546_s6 + $0x100] sm:$0xff]  ;;  %v1613_v2 = vld [vmem:[%s2545_s5 + $0x178] sm:$0xff] }
  0x32   :  { %421 = vmatpush.msrb.mxu0 %v1623_v5  ;;  %450 = vmatpush.msrb.mxu1 %v1591_v9  ;;  %v1610_v5 = vld [vmem:[%s2545_s5 + $0x160] sm:$0xff] }
  0x33   :  { %v1606_v9 = vld [vmem:[%s2545_s5 + $0x140] sm:$0xff] }
  0x34   :  { %422 = vmatpush.msrb.mxu0 %v1622_v11  ;;  %451 = vmatpush.msrb.mxu1 %v1590_v13  ;;  %v1604_v11 = vld [vmem:[%s2545_s5 + $0x130] sm:$0xff]  ;;  %v1721_v13 = vld [vmem:[%s2548_s8] ss:$0 sm:$0xff] }
  0x36   :  { %423 = vmatpush.msrb.mxu0 %v1621_v15  ;;  %452 = vmatpush.msrb.mxu1 %v1589_v17 }
  0x38   :  { %424 = vmatpush.msrb.mxu0 %v1620_v19  ;;  %453 = vmatpush.msrb.mxu1 %v1588_v21  ;;  %v1600_v21 = vld [vmem:[%s2545_s5 + $0x110] sm:$0xff] }
  0x3a   :  { %425 = vmatpush.msrb.mxu0 %v1619_v26  ;;  %454 = vmatpush.msrb.mxu1 %v1587_v27  ;;  %v1598_v27 = vld [vmem:[%s2545_s5 + $0x100] sm:$0xff] }
  0x3c   :  { %426 = vmatpush.msrb.mxu0 %v1618_v46 }
  0x3e   :  { %427 = vmatpush.msrb.mxu0 %v1617_v51 }
  0xa2   :  { %v108_v34 = vpop.f32.mrf.mxu0  ;;  %v131_v35 = vpop.f32.mrf.mxu1 }
  0xaa   :  { %v111_v36 = vpop.f32.mrf.mxu0  ;;  %v134_v37 = vpop.f32.mrf.mxu1 }
  0xab   :  { %173 = vmatpush.msra.mxu2 %v134_v37  ;;  %214 = vmatpush.msra.mxu3 %v111_v36  ;;  %v2127_v36 = vld [vmem:[%s2540_s0 + $0x8] sm:$0xff]  ;;  %v1641_v37 = vld [vmem:[%s2546_s6 + $0x158] sm:$0xff] }
  0xad   :  { %174 = vmatpush.msra.mxu2 %v131_v35  ;;  %215 = vmatpush.msra.mxu3 %v108_v34  ;;  %v1643_v34 = vld [vmem:[%s2546_s6 + $0x168] sm:$0xff]  ;;  %v1642_v35 = vld [vmem:[%s2546_s6 + $0x160] sm:$0xff] }
  0xae   :  { %1574 = vmatmul.msk.f32.vlgmr.msra.gmra.mxu2 %vm146_vm0, %v1570_v38  ;;  %1578 = vmatmul.msk.f32.vlgmr.msra.gmra.mxu3 %vm146_vm0, %v137_v39  ;;  %v1640_v38 = vld [vmem:[%s2546_s6 + $0x150] sm:$0xff]  ;;  %v1639_v39 = vld [vmem:[%s2546_s6 + $0x148] sm:$0xff] }
  0xaf   :  { %386 = vmatpush.msrb.mxu3 %v268_v40  ;;  %357 = vmatpush.msrb.mxu2 %v318_v42  ;;  %v1638_v40 = vld [vmem:[%s2546_s6 + $0x140] sm:$0xff]  ;;  %v1637_v42 = vld [vmem:[%s2546_s6 + $0x138] sm:$0xff] }
  0xb1   :  { %387 = vmatpush.msrb.mxu3 %v267_v41  ;;  %358 = vmatpush.msrb.mxu2 %v317_v45  ;;  %v2145_v41 = vld [vmem:[%s2540_s0 + $0x10] sm:$0xff]  ;;  %v307_v45 = vld [vmem:[%s2546_s6 + $0x20] sm:$0xff] }
  0xb3   :  { %388 = vmatpush.msrb.mxu3 %v266_v47  ;;  %359 = vmatpush.msrb.mxu2 %v316_v49  ;;  %v1586_v47 = vld [vmem:[%s2545_s5 + $0xa0] sm:$0xff]  ;;  %v2172_v49 = vld [vmem:[%s2540_s0 + $0x18] sm:$0xff] }
  0xb4   :  { %455 = vmatpush.msrb.mxu1 %v1586_v47 }
  0xb5   :  { %389 = vmatpush.msrb.mxu3 %v265_v52  ;;  %360 = vmatpush.msrb.mxu2 %v315_v55  ;;  %v1585_v52 = vld [vmem:[%s2545_s5 + $0x98] sm:$0xff]  ;;  %v1616_v55 = vld [vmem:[%s2546_s6 + $0x90] sm:$0xff] }
  0xb6   :  { %1575 = vmatmul.msk.f32.gmra.mxu2 %vm146_vm0, %v1571_v53  ;;  %1579 = vmatmul.msk.f32.gmra.mxu3 %vm146_vm0, %v138_v54  ;;  %v1633_v53 = vld [vmem:[%s2546_s6 + $0x118] sm:$0xff]  ;;  %v305_v54 = vld [vmem:[%s2546_s6 + $0x10] sm:$0xff] }
  0xb7   :  { %390 = vmatpush.msrb.mxu3 %v264_v56  ;;  %361 = vmatpush.msrb.mxu2 %v314_v60  ;;  %v1584_v56 = vld [vmem:[%s2545_s5 + $0x90] sm:$0xff]  ;;  %v1583_v60 = vld [vmem:[%s2545_s5 + $0x88] sm:$0xff] }
  0xb8   :  { %456 = vmatpush.msrb.mxu1 %v1585_v52  ;;  %428 = vmatpush.msrb.mxu0 %v1616_v55 }
  0xb9   :  { %391 = vmatpush.msrb.mxu3 %v263_v59  ;;  %362 = vmatpush.msrb.mxu2 %v313_v63  ;;  %v1615_v59 = vld [vmem:[%s2546_s6 + $0x88] sm:$0xff]  ;;  %v1614_v63 = vld [vmem:[%s2546_s6 + $0x80] sm:$0xff] }
  0xba   :  { %457 = vmatpush.msrb.mxu1 %v1584_v56  ;;  %429 = vmatpush.msrb.mxu0 %v1615_v59 }
  0xbb   :  { %392 = vmatpush.msrb.mxu3 %v262_v0  ;;  %363 = vmatpush.msrb.mxu2 %v312_v3  ;;  %v1582_v0 = vld [vmem:[%s2545_s5 + $0x80] sm:$0xff]  ;;  %v1612_v3 = vld [vmem:[%s2545_s5 + $0x170] sm:$0xff] }
  0xbc   :  { %458 = vmatpush.msrb.mxu1 %v1583_v60  ;;  %430 = vmatpush.msrb.mxu0 %v1614_v63 }
  0xbd   :  { %393 = vmatpush.msrb.mxu3 %v261_v4  ;;  %364 = vmatpush.msrb.mxu2 %v311_v10  ;;  %v1611_v4 = vld [vmem:[%s2545_s5 + $0x168] sm:$0xff]  ;;  %v1605_v10 = vld [vmem:[%s2545_s5 + $0x138] sm:$0xff] }
  0xbe   :  { %1576 = vmatmul.msk.f32.gmra.mxu2 %vm146_vm0, %v1572_v6  ;;  %1580 = vmatmul.msk.f32.gmra.mxu3 %vm146_vm0, %v139_v7  ;;  %v1609_v6 = vld [vmem:[%s2545_s5 + $0x158] sm:$0xff]  ;;  %v1608_v7 = vld [vmem:[%s2545_s5 + $0x150] sm:$0xff] }
  0xbf   :  { %394 = vmatpush.msrb.mxu3 %v260_v8  ;;  %365 = vmatpush.msrb.mxu2 %v310_v14  ;;  %v1607_v8 = vld [vmem:[%s2545_s5 + $0x148] sm:$0xff]  ;;  %v1602_v14 = vld [vmem:[%s2545_s5 + $0x120] sm:$0xff] }
  0xc0   :  { %459 = vmatpush.msrb.mxu1 %v1582_v0  ;;  %544 = vmatpush.msra.mxu0 %v1613_v2 }
  0xc1   :  { %395 = vmatpush.msrb.mxu3 %v259_v12  ;;  %366 = vmatpush.msrb.mxu2 %v309_v18  ;;  %v1603_v12 = vld [vmem:[%s2545_s5 + $0x128] sm:$0xff]  ;;  %v1722_v18 = vld [vmem:[%s2548_s8 + $0x1] ss:$0 sm:$0xff] }
  0xc2   :  { %460 = vmatmul.f32.vlgmr.msrb.gmra.mxu1 %v2109_v31  ;;  %545 = vmatpush.msra.mxu0 %v1612_v3  ;;  %v2296_v3 = vld [vmem:[%s2542_s2] sm:$0xff] }
  0xc3   :  { %396 = vmatpush.msrb.mxu3 %v258_v16  ;;  %367 = vmatpush.msrb.mxu2 %v308_v25 }
  0xc4   :  { %546 = vmatpush.msra.mxu0 %v1611_v4 }
  0xc5   :  { %397 = vmatpush.msrb.mxu3 %v257_v20  ;;  %368 = vmatpush.msrb.mxu2 %v307_v45  ;;  %v1601_v20 = vld [vmem:[%s2545_s5 + $0x118] sm:$0xff] }
  0xc6   :  { %1577 = vmatmul.msk.f32.gmra.mxu2 %vm146_vm0, %v1573_v22  ;;  %1581 = vmatmul.msk.f32.gmra.mxu3 %vm146_vm0, %v140_v23  ;;  %v1599_v23 = vld [vmem:[%s2545_s5 + $0x108] sm:$0xff] }
  0xc7   :  { %398 = vmatpush.msrb.mxu3 %v256_v24  ;;  %369 = vmatpush.msrb.mxu2 %v306_v50 }
  0xc8   :  { %547 = vmatpush.msra.mxu0 %v1610_v5  ;;  %v2303_v5 = vld [vmem:[%s2542_s2 + $0x8] sm:$0xff] }
  0xc9   :  { %399 = vmatpush.msrb.mxu3 %v255_v28  ;;  %370 = vmatpush.msrb.mxu2 %v305_v54 }
  0xca   :  { %463 = vmatmul.f32.gmra.mxu1 %v2127_v36  ;;  %548 = vmatpush.msra.mxu0 %v1609_v6 }
  0xcb   :  { %400 = vmatpush.msrb.mxu3 %v254_v29  ;;  %371 = vmatpush.msrb.mxu2 %v304_v58 }
  0xcc   :  { %549 = vmatpush.msra.mxu0 %v1608_v7 }
  0xcd   :  { %401 = vmatpush.msrb.mxu3 %v253_v30  ;;  %372 = vmatpush.msrb.mxu2 %v303_v62 }
  0xce   :  { %402 = vmatmul.f32.vlgmr.msrb.gmra.mxu3 %v2109_v31  ;;  %550 = vmatpush.msra.mxu0 %v1607_v8  ;;  %v2310_v8 = vld [vmem:[%s2542_s2 + $0x10] sm:$0xff] }
  0xcf   :  { %515 = vmatpush.msra.mxu3 %v1645_v32 }
  0xd0   :  { %551 = vmatpush.msra.mxu0 %v1606_v9 }
  0xd1   :  { %516 = vmatpush.msra.mxu3 %v1644_v33 }
  0xd2   :  { %466 = vmatmul.f32.gmra.mxu1 %v2145_v41  ;;  %552 = vmatpush.msra.mxu0 %v1605_v10 }
  0xd3   :  { %517 = vmatpush.msra.mxu3 %v1643_v34 }
  0xd4   :  { %553 = vmatpush.msra.mxu0 %v1604_v11 }
  0xd5   :  { %518 = vmatpush.msra.mxu3 %v1642_v35 }
  0xd6   :  { %405 = vmatmul.f32.gmra.mxu3 %v2127_v36  ;;  %554 = vmatpush.msra.mxu0 %v1603_v12 }
  0xd7   :  { %519 = vmatpush.msra.mxu3 %v1641_v37 }
  0xd8   :  { %555 = vmatpush.msra.mxu0 %v1602_v14  ;;  %v2317_v14 = vld [vmem:[%s2542_s2 + $0x18] sm:$0xff] }
  0xd9   :  { %520 = vmatpush.msra.mxu3 %v1640_v38 }
  0xda   :  { %469 = vmatmul.f32.gmra.mxu1 %v2172_v49  ;;  %556 = vmatpush.msra.mxu0 %v1601_v20  ;;  %v657_v20 = vld [vmem:[#allocation2 + $0x78] sm:$0xff] }
  0xdb   :  { %521 = vmatpush.msra.mxu3 %v1639_v39 }
  0xdc   :  { %557 = vmatpush.msra.mxu0 %v1600_v21  ;;  %v674_v21 = vld [vmem:[#allocation2 + $0xf8] sm:$0xff] }
  0xdd   :  { %522 = vmatpush.msra.mxu3 %v1638_v40 }
  0xde   :  { %408 = vmatmul.f32.gmra.mxu3 %v2145_v41  ;;  %558 = vmatpush.msra.mxu0 %v1599_v23  ;;  %v656_v23 = vld [vmem:[#allocation2 + $0x70] sm:$0xff] }
  0xdf   :  { %523 = vmatpush.msra.mxu3 %v1637_v42 }
  0xe0   :  { %559 = vmatpush.msra.mxu0 %v1598_v27  ;;  %v672_v27 = vld [vmem:[#allocation2 + $0xe8] sm:$0xff] }
  0xe1   :  { %524 = vmatpush.msra.mxu3 %v1636_v43 }
  0xe3   :  { %525 = vmatpush.msra.mxu3 %v1635_v44 }
  0xe5   :  { %526 = vmatpush.msra.mxu3 %v1634_v48 }
  0xe6   :  { %411 = vmatmul.f32.gmra.mxu3 %v2172_v49 }
  0xe7   :  { %527 = vmatpush.msra.mxu3 %v1633_v53 }
  0xe9   :  { %528 = vmatpush.msra.mxu3 %v1632_v57 }
  0xeb   :  { %529 = vmatpush.msra.mxu3 %v1631_v61 }
  0xed   :  { %530 = vmatpush.msra.mxu3 %v1630_v1 }
  0xef   :  { %796 = vmatpush.msrb.mxu3 %v674_v21 }
 0x131   :  { %v176_v15 = vpop.f32.mrf.mxu2  ;;  %v217_v16 = vpop.f32.mrf.mxu3 }
 0x132   :  { %v218_v17 = vadd.f32 %v217_v16, %v176_v15  ;;  %v2322_v16 = vld [vmem:[%s2542_s2 + $0x20] sm:$0xff] }
 0x134   :  { %v231_v19 = vmul.f32 %v1721_v13, %v218_v17  ;;  %v2331_v17 = vld [vmem:[%s2542_s2 + $0x28] sm:$0xff] }
 0x136   :  { %v237_v22 = vadd.f32 %v1722_v18, %v231_v19  ;;  %v2345_v19 = vld [vmem:[%s2542_s2 + $0x38] sm:$0xff] }
 0x138   :  { %vm241_vm1 = vcmp.gt.f32.partialorder %v237_v22, 0.0  ;;  %v245_v24 = vmul.f32 0.1, %v237_v22 }
 0x139   :  { %v179_v25 = vpop.f32.mrf.mxu2  ;;  %v220_v26 = vpop.f32.mrf.mxu3 }
 0x13a   :  { %v221_v28 = vadd.f32 %v220_v26, %v179_v25  ;;  %v249_v29 = vsel %vm241_vm1, %v237_v22, %v245_v24  ;;  %v691_v22 = vld [vmem:[#allocation2 + $0x178] sm:$0xff]  ;;  %v673_v24 = vld [vmem:[#allocation2 + $0xf0] sm:$0xff]  ;;  %v655_v26 = vld [vmem:[#allocation2 + $0x68] sm:$0xff] }
 0x13b   :  { %373 = vmatmul.f32.vlgmr.msrb.gmra.mxu2 %v249_v29  ;;  %431 = vmatmul.f32.vlgmr.msrb.gmra.mxu0 %v249_v29  ;;  %v690_v25 = vld [vmem:[#allocation2 + $0x170] sm:$0xff] }
 0x13c   :  { %v232_v30 = vmul.f32 %v1721_v13, %v221_v28  ;;  %531 = vmatmul.f32.vlgmr.msra.gmra.mxu3 %v249_v29  ;;  %v689_v28 = vld [vmem:[#allocation2 + $0x168] sm:$0xff]  ;;  %v654_v29 = vld [vmem:[#allocation2 + $0x60] sm:$0xff] }
 0x13d   :  { %797 = vmatpush.msrb.mxu3 %v673_v24 }
 0x13e   :  { %v238_v32 = vadd.f32 %v1722_v18, %v232_v30  ;;  %v671_v30 = vld [vmem:[#allocation2 + $0xe0] sm:$0xff] }
 0x13f   :  { %798 = vmatpush.msrb.mxu3 %v672_v27  ;;  %v1724_v27 = vld [vmem:[%s2548_s8 + $0x3] ss:$0 sm:$0xff] }
 0x140   :  { %vm242_vm2 = vcmp.gt.f32.partialorder %v238_v32, 0.0  ;;  %v246_v33 = vmul.f32 0.1, %v238_v32 }
 0x141   :  { %v182_v34 = vpop.f32.mrf.mxu2  ;;  %v223_v35 = vpop.f32.mrf.mxu3  ;;  %799 = vmatpush.msrb.mxu3 %v671_v30 }
 0x142   :  { %v224_v37 = vadd.f32 %v223_v35, %v182_v34  ;;  %v250_v38 = vsel %vm242_vm2, %v238_v32, %v246_v33  ;;  %v688_v32 = vld [vmem:[#allocation2 + $0x160] sm:$0xff]  ;;  %v653_v33 = vld [vmem:[#allocation2 + $0x58] sm:$0xff] }
 0x143   :  { %376 = vmatmul.f32.gmra.mxu2 %v250_v38  ;;  %434 = vmatmul.f32.gmra.mxu0 %v250_v38  ;;  %v670_v34 = vld [vmem:[#allocation2 + $0xd8] sm:$0xff] }
 0x144   :  { %v233_v39 = vmul.f32 %v1721_v13, %v224_v37  ;;  %534 = vmatmul.f32.gmra.mxu3 %v250_v38  ;;  %v687_v35 = vld [vmem:[#allocation2 + $0x158] sm:$0xff]  ;;  %v2349_v37 = vpop.f32.mrf.mxu1  ;;  %v652_v38 = vld [vmem:[#allocation2 + $0x50] sm:$0xff] }
 0x145   :  { %800 = vmatpush.msrb.mxu3 %v670_v34 }
 0x146   :  { %v239_v40 = vadd.f32 %v1722_v18, %v233_v39  ;;  %v669_v39 = vld [vmem:[#allocation2 + $0xd0] sm:$0xff] }
 0x147   :  { %801 = vmatpush.msrb.mxu3 %v669_v39 }
 0x148   :  { %vm243_vm3 = vcmp.gt.f32.partialorder %v239_v40, 0.0  ;;  %v247_v42 = vmul.f32 0.1, %v239_v40 }
 0x149   :  { %v185_v43 = vpop.f32.mrf.mxu2  ;;  %v226_v44 = vpop.f32.mrf.mxu3 }
 0x14a   :  { %v227_v45 = vadd.f32 %v226_v44, %v185_v43  ;;  %v251_v46 = vsel %vm243_vm3, %v239_v40, %v247_v42  ;;  %v686_v40 = vld [vmem:[#allocation2 + $0x150] sm:$0xff]  ;;  %v651_v42 = vld [vmem:[#allocation2 + $0x48] sm:$0xff] }
 0x14b   :  { %379 = vmatmul.f32.gmra.mxu2 %v251_v46  ;;  %437 = vmatmul.f32.gmra.mxu0 %v251_v46  ;;  %v668_v43 = vld [vmem:[#allocation2 + $0xc8] sm:$0xff] }
 0x14c   :  { %v234_v47 = vmul.f32 %v1721_v13, %v227_v45  ;;  %537 = vmatmul.f32.gmra.mxu3 %v251_v46  ;;  %v685_v44 = vld [vmem:[#allocation2 + $0x148] sm:$0xff]  ;;  %v650_v45 = vld [vmem:[#allocation2 + $0x40] sm:$0xff] }
 0x14d   :  { %802 = vmatpush.msrb.mxu3 %v668_v43  ;;  %v667_v46 = vld [vmem:[#allocation2 + $0xc0] sm:$0xff] }
 0x14e   :  { %v240_v48 = vadd.f32 %v1722_v18, %v234_v47  ;;  %v2338_v18 = vld [vmem:[%s2542_s2 + $0x30] sm:$0xff]  ;;  %v684_v47 = vld [vmem:[#allocation2 + $0x140] sm:$0xff] }
 0x14f   :  { %803 = vmatpush.msrb.mxu3 %v667_v46 }
 0x150   :  { %vm244_vm4 = vcmp.gt.f32.partialorder %v240_v48, 0.0  ;;  %v248_v50 = vmul.f32 0.1, %v240_v48 }
 0x151   :  { %v403_v52 = vpop.f32.mrf.mxu3 }
 0x152   :  { %v252_v51 = vsel %vm244_vm4, %v240_v48, %v248_v50  ;;  %v649_v48 = vld [vmem:[#allocation2 + $0x38] sm:$0xff] }
 0x153   :  { %382 = vmatmul.f32.gmra.mxu2 %v252_v51  ;;  %440 = vmatmul.f32.gmra.mxu0 %v252_v51  ;;  %v666_v50 = vld [vmem:[#allocation2 + $0xb8] sm:$0xff] }
 0x154   :  { %540 = vmatmul.f32.gmra.mxu3 %v252_v51  ;;  %v683_v51 = vld [vmem:[#allocation2 + $0x138] sm:$0xff] }
 0x155   :  { %804 = vmatpush.msrb.mxu3 %v666_v50 }
 0x159   :  { %v406_v53 = vpop.f32.mrf.mxu3 }
 0x15b   :  { %560 = vmatmul.f32.vlgmr.msra.gmra.mxu0 %v2109_v31 }
 0x161   :  { %v409_v55 = vpop.f32.mrf.mxu3 }
 0x163   :  { %563 = vmatmul.f32.gmra.mxu0 %v2127_v36 }
 0x169   :  { %v412_v59 = vpop.f32.mrf.mxu3 }
 0x16b   :  { %566 = vmatmul.f32.gmra.mxu0 %v2145_v41 }
 0x173   :  { %569 = vmatmul.f32.gmra.mxu0 %v2172_v49 }
 0x1b8   :  { %v2285_v54 = vpop.f32.mrf.mxu0 }
 0x1b9   :  { %v462_v21 = vadd.f32 %v2349_v37, %v2285_v54  ;;  %v1725_v54 = vld [vmem:[%s2548_s8 + $0x4] ss:$0 sm:$0xff] }
 0x1be   :  { %v374_v56 = vpop.f32.mrf.mxu2 }
 0x1bf   :  { %v532_v36 = vpop.f32.mrf.mxu3  ;;  %v404_v2 = vadd.f32 %v403_v52, %v374_v56  ;;  %v464_v52 = vpop.f32.mrf.mxu1  ;;  %v682_v56 = vld [vmem:[#allocation2 + $0x130] sm:$0xff] }
 0x1c0   :  { %v2287_v57 = vpop.f32.mrf.mxu0 }
 0x1c6   :  { %v377_v58 = vpop.f32.mrf.mxu2 }
 0x1c7   :  { %v407_v0 = vadd.f32 %v406_v53, %v377_v58  ;;  %v535_v1 = vpop.f32.mrf.mxu3  ;;  %v648_v53 = vld [vmem:[#allocation2 + $0x30] sm:$0xff]  ;;  %v647_v58 = vld [vmem:[#allocation2 + $0x28] sm:$0xff] }
 0x1c8   :  { %v2289_v60 = vpop.f32.mrf.mxu0 }
 0x1ce   :  { %v380_v61 = vpop.f32.mrf.mxu2 }
 0x1cf   :  { %v410_v49 = vadd.f32 %v409_v55, %v380_v61  ;;  %v538_v6 = vpop.f32.mrf.mxu3  ;;  %v665_v55 = vld [vmem:[#allocation2 + $0xb0] sm:$0xff]  ;;  %v681_v61 = vld [vmem:[#allocation2 + $0x128] sm:$0xff] }
 0x1d0   :  { %v2291_v31 = vpop.f32.mrf.mxu0  ;;  %805 = vmatpush.msrb.mxu3 %v665_v55 }
 0x1d6   :  { %v383_v62 = vpop.f32.mrf.mxu2 }
 0x1d7   :  { %v413_v41 = vadd.f32 %v412_v59, %v383_v62  ;;  %v541_v9 = vpop.f32.mrf.mxu3  ;;  %v664_v59 = vld [vmem:[#allocation2 + $0xa8] sm:$0xff]  ;;  %v663_v62 = vld [vmem:[#allocation2 + $0xa0] sm:$0xff] }
 0x1d8   :  { %v561_v63 = vpop.f32.mrf.mxu0  ;;  %806 = vmatpush.msrb.mxu3 %v664_v59 }
 0x1d9   :  { %498 = vmatpush.msra.mxu2 %v413_v41  ;;  %v562_v15 = vadd.f32 %v561_v63, %v532_v36  ;;  %v646_v36 = vld [vmem:[#allocation2 + $0x20] sm:$0xff]  ;;  %v645_v63 = vld [vmem:[#allocation2 + $0x18] sm:$0xff] }
 0x1da   :  { %v680_v41 = vld [vmem:[#allocation2 + $0x120] sm:$0xff]  ;;  %807 = vmatpush.msrb.mxu3 %v663_v62 }
 0x1db   :  { %499 = vmatpush.msra.mxu2 %v410_v49  ;;  %v662_v49 = vld [vmem:[#allocation2 + $0x98] sm:$0xff] }
 0x1dc   :  { %808 = vmatpush.msrb.mxu3 %v662_v49 }
 0x1dd   :  { %500 = vmatpush.msra.mxu2 %v407_v0  ;;  %v679_v0 = vld [vmem:[#allocation2 + $0x118] sm:$0xff] }
 0x1df   :  { %501 = vmatpush.msra.mxu2 %v404_v2  ;;  %v661_v2 = vld [vmem:[#allocation2 + $0x90] sm:$0xff] }
 0x1e0   :  { %1646 = vmatmul.msk.f32.vlgmr.msra.gmra.mxu2 %vm473_vm5, %v2296_v3  ;;  %v564_v4 = vpop.f32.mrf.mxu0  ;;  %809 = vmatpush.msrb.mxu3 %v661_v2 }
 0x1e1   :  { %v565_v13 = vadd.f32 %v564_v4, %v535_v1  ;;  %767 = vmatpush.msrb.mxu2 %v657_v20  ;;  %v644_v1 = vld [vmem:[#allocation2 + $0x10] sm:$0xff] }
 0x1e2   :  { %v678_v4 = vld [vmem:[#allocation2 + $0x110] sm:$0xff] }
 0x1e3   :  { %768 = vmatpush.msrb.mxu2 %v656_v23  ;;  %v1723_v23 = vld [vmem:[%s2548_s8 + $0x2] ss:$0 sm:$0xff] }
 0x1e5   :  { %769 = vmatpush.msrb.mxu2 %v655_v26 }
 0x1e7   :  { %770 = vmatpush.msrb.mxu2 %v654_v29  ;;  %v465_v29 = vadd.f32 %v464_v52, %v2287_v57 }
 0x1e8   :  { %1647 = vmatmul.msk.f32.gmra.mxu2 %vm473_vm5, %v2303_v5  ;;  %v567_v7 = vpop.f32.mrf.mxu0 }
 0x1e9   :  { %v568_v12 = vadd.f32 %v567_v7, %v538_v6  ;;  %771 = vmatpush.msrb.mxu2 %v653_v33  ;;  %v467_v6 = vpop.f32.mrf.mxu1  ;;  %v643_v7 = vld [vmem:[#allocation2 + $0x8] sm:$0xff] }
 0x1ea   :  { %v468_v43 = vadd.f32 %v467_v6, %v2289_v60 }
 0x1eb   :  { %772 = vmatpush.msrb.mxu2 %v652_v38 }
 0x1ed   :  { %773 = vmatpush.msrb.mxu2 %v651_v42 }
 0x1ef   :  { %774 = vmatpush.msrb.mxu2 %v650_v45 }
 0x1f0   :  { %1648 = vmatmul.msk.f32.gmra.mxu2 %vm473_vm5, %v2310_v8  ;;  %v570_v10 = vpop.f32.mrf.mxu0 }
 0x1f1   :  { %v571_v11 = vadd.f32 %v570_v10, %v541_v9  ;;  %775 = vmatpush.msrb.mxu2 %v649_v48  ;;  %v660_v9 = vld [vmem:[#allocation2 + $0x88] sm:$0xff]  ;;  %v470_v20 = vpop.f32.mrf.mxu1 }
 0x1f2   :  { %v677_v10 = vld [vmem:[#allocation2 + $0x108] sm:$0xff]  ;;  %810 = vmatpush.msrb.mxu3 %v660_v9  ;;  %v471_v60 = vadd.f32 %v470_v20, %v2291_v31 }
 0x1f3   :  { %597 = vmatpush.msra.mxu1 %v571_v11  ;;  %776 = vmatpush.msrb.mxu2 %v648_v53  ;;  %v642_v11 = vld [vmem:[#allocation2] sm:$0xff] }
 0x1f5   :  { %598 = vmatpush.msra.mxu1 %v568_v12  ;;  %777 = vmatpush.msrb.mxu2 %v647_v58  ;;  %v659_v12 = vld [vmem:[#allocation2 + $0x80] sm:$0xff] }
 0x1f6   :  { %811 = vmatpush.msrb.mxu3 %v659_v12 }
 0x1f7   :  { %599 = vmatpush.msra.mxu1 %v565_v13  ;;  %778 = vmatpush.msrb.mxu2 %v646_v36  ;;  %v676_v13 = vld [vmem:[#allocation2 + $0x100] sm:$0xff] }
 0x1f8   :  { %1649 = vmatmul.msk.f32.gmra.mxu2 %vm473_vm5, %v2317_v14 }
 0x1f9   :  { %600 = vmatpush.msra.mxu1 %v562_v15  ;;  %779 = vmatpush.msrb.mxu2 %v645_v63 }
 0x1fa   :  { %1650 = vmatmul.msk.f32.vlgmr.msra.gmra.mxu1 %vm473_vm5, %v2322_v16 }
 0x1fb   :  { %854 = vmatpush.msrb.mxu1 %v691_v22  ;;  %780 = vmatpush.msrb.mxu2 %v644_v1 }
 0x1fd   :  { %855 = vmatpush.msrb.mxu1 %v690_v25  ;;  %781 = vmatpush.msrb.mxu2 %v643_v7 }
 0x1ff   :  { %856 = vmatpush.msrb.mxu1 %v689_v28  ;;  %782 = vmatpush.msrb.mxu2 %v642_v11 }
 0x201   :  { %857 = vmatpush.msrb.mxu1 %v688_v32 }
 0x202   :  { %1651 = vmatmul.msk.f32.gmra.mxu1 %vm473_vm5, %v2331_v17 }
 0x203   :  { %858 = vmatpush.msrb.mxu1 %v687_v35  ;;  %v1726_v35 = vld [vmem:[%s2548_s8 + $0x5] ss:$0 sm:$0xff] }
 0x205   :  { %859 = vmatpush.msrb.mxu1 %v686_v40 }
 0x207   :  { %860 = vmatpush.msrb.mxu1 %v685_v44 }
 0x209   :  { %861 = vmatpush.msrb.mxu1 %v684_v47 }
 0x20a   :  { %1652 = vmatmul.msk.f32.gmra.mxu1 %vm473_vm5, %v2338_v18 }
 0x20b   :  { %862 = vmatpush.msrb.mxu1 %v683_v51 }
 0x20d   :  { %863 = vmatpush.msrb.mxu1 %v682_v56 }
 0x20f   :  { %864 = vmatpush.msrb.mxu1 %v681_v61 }
 0x211   :  { %865 = vmatpush.msrb.mxu1 %v680_v41 }
 0x212   :  { %1653 = vmatmul.msk.f32.gmra.mxu1 %vm473_vm5, %v2345_v19 }
 0x213   :  { %866 = vmatpush.msrb.mxu1 %v679_v0 }
 0x215   :  { %867 = vmatpush.msrb.mxu1 %v678_v4 }
 0x217   :  { %868 = vmatpush.msrb.mxu1 %v677_v10 }
 0x219   :  { %869 = vmatpush.msrb.mxu1 %v676_v13 }
 0x263   :  { %v503_v15 = vpop.f32.mrf.mxu2 }
 0x264   :  { %v504_v22 = vadd.f32 %v503_v15, %v462_v21 }
 0x26b   :  { %v506_v24 = vpop.f32.mrf.mxu2 }
 0x26c   :  { %v507_v32 = vadd.f32 %v506_v24, %v465_v29  ;;  %v742_v29 = vld [vmem:[#allocation2 + $0x2f8] sm:$0xff] }
 0x273   :  { %v509_v39 = vpop.f32.mrf.mxu2 }
 0x274   :  { %v510_v46 = vadd.f32 %v509_v39, %v468_v43  ;;  %v724_v39 = vld [vmem:[#allocation2 + $0x270] sm:$0xff] }
 0x275   :  { %v703_v43 = vld [vmem:[#allocation2 + $0x1d0] sm:$0xff] }
 0x277   :  { %v602_v25 = vpop.f32.mrf.mxu1 }
 0x278   :  { %v614_v26 = vadd.f32 %v602_v25, %v504_v22 }
 0x27a   :  { %v620_v28 = vmul.f32 %v1723_v23, %v614_v26 }
 0x27b   :  { %v512_v56 = vpop.f32.mrf.mxu2 }
 0x27c   :  { %v626_v30 = vadd.f32 %v1724_v27, %v620_v28  ;;  %v513_v36 = vadd.f32 %v512_v56, %v471_v60  ;;  %v708_v28 = vld [vmem:[#allocation2 + $0x1f8] sm:$0xff]  ;;  %v719_v56 = vld [vmem:[#allocation2 + $0x248] sm:$0xff]  ;;  %v699_v60 = vld [vmem:[#allocation2 + $0x1b0] sm:$0xff] }
 0x27d   :  { %940 = vmatpush.msra.mxu3 %v708_v28  ;;  %v1727_v28 = vld [vmem:[%s2548_s8 + $0x6] ss:$0 sm:$0xff] }
 0x27e   :  { %vm630_vm6 = vcmp.gt.f32.partialorder %v626_v30, 0.0  ;;  %v634_v33 = vmul.f32 0.1, %v626_v30 }
 0x27f   :  { %v605_v34 = vpop.f32.mrf.mxu1 }
 0x280   :  { %v2366_v37 = vsel %vm630_vm6, %v626_v30, %v634_v33  ;;  %v615_v38 = vadd.f32 %v605_v34, %v507_v32  ;;  %v707_v30 = vld [vmem:[#allocation2 + $0x1f0] sm:$0xff]  ;;  %v706_v32 = vld [vmem:[#allocation2 + $0x1e8] sm:$0xff]  ;;  %v725_v34 = vld [vmem:[#allocation2 + $0x278] sm:$0xff] }
 0x281   :  { %v745_v40 = vmul.f32 %v1725_v54, %v2366_v37  ;;  %941 = vmatpush.msra.mxu3 %v707_v30  ;;  %v740_v33 = vld [vmem:[#allocation2 + $0x2e8] sm:$0xff]  ;;  %v1728_v30 = vld [vmem:[%s2548_s8 + $0x7] ss:$0 sm:$0xff] }
 0x282   :  { %v621_v57 = vmul.f32 %v1723_v23, %v615_v38  ;;  %v739_v38 = vld [vmem:[#allocation2 + $0x2e0] sm:$0xff] }
 0x283   :  { %v751_v42 = vadd.f32 %v1726_v35, %v745_v40  ;;  %942 = vmatpush.msra.mxu3 %v706_v32  ;;  %v704_v40 = vld [vmem:[#allocation2 + $0x1d8] sm:$0xff] }
 0x284   :  { %v627_v44 = vadd.f32 %v1724_v27, %v621_v57  ;;  %v738_v57 = vld [vmem:[#allocation2 + $0x2d8] sm:$0xff] }
 0x285   :  { %vm755_vm7 = vcmp.gt.f32.partialorder %v751_v42, 0.0  ;;  %v759_v45 = vmul.f32 0.1, %v751_v42 }
 0x286   :  { %vm631_vm8 = vcmp.gt.f32.partialorder %v627_v44, 0.0  ;;  %v635_v47 = vmul.f32 0.1, %v627_v44 }
 0x287   :  { %v608_v48 = vpop.f32.mrf.mxu1  ;;  %v763_v50 = vsel %vm755_vm7, %v751_v42, %v759_v45  ;;  %v723_v42 = vld [vmem:[#allocation2 + $0x268] sm:$0xff]  ;;  %v722_v45 = vld [vmem:[#allocation2 + $0x260] sm:$0xff] }
 0x288   :  { %v2370_v51 = vsel %vm631_vm8, %v627_v44, %v635_v47  ;;  %v616_v52 = vadd.f32 %v608_v48, %v510_v46  ;;  %783 = vmatmul.f32.vlgmr.msrb.gmra.mxu2 %v763_v50  ;;  %812 = vmatmul.f32.vlgmr.msrb.gmra.mxu3 %v763_v50  ;;  %v737_v44 = vld [vmem:[#allocation2 + $0x2d0] sm:$0xff]  ;;  %v702_v46 = vld [vmem:[#allocation2 + $0x1c8] sm:$0xff]  ;;  %v721_v47 = vld [vmem:[#allocation2 + $0x258] sm:$0xff] }
 0x289   :  { %870 = vmatmul.f32.vlgmr.msrb.gmra.mxu1 %v763_v50  ;;  %v746_v53 = vmul.f32 %v1725_v54, %v2370_v51  ;;  %v736_v48 = vld [vmem:[#allocation2 + $0x2c8] sm:$0xff]  ;;  %v701_v50 = vld [vmem:[#allocation2 + $0x1c0] sm:$0xff] }
 0x28a   :  { %v622_v55 = vmul.f32 %v1723_v23, %v616_v52  ;;  %v720_v52 = vld [vmem:[#allocation2 + $0x250] sm:$0xff] }
 0x28b   :  { %v752_v58 = vadd.f32 %v1726_v35, %v746_v53  ;;  %v735_v53 = vld [vmem:[#allocation2 + $0x2c0] sm:$0xff] }
 0x28c   :  { %v628_v59 = vadd.f32 %v1724_v27, %v622_v55  ;;  %v700_v55 = vld [vmem:[#allocation2 + $0x1b8] sm:$0xff] }
 0x28d   :  { %vm756_vm9 = vcmp.gt.f32.partialorder %v752_v58, 0.0  ;;  %v760_v61 = vmul.f32 0.1, %v752_v58 }
 0x28e   :  { %vm632_vm10 = vcmp.gt.f32.partialorder %v628_v59, 0.0  ;;  %v636_v62 = vmul.f32 0.1, %v628_v59 }
 0x28f   :  { %v611_v41 = vpop.f32.mrf.mxu1  ;;  %v764_v63 = vsel %vm756_vm9, %v752_v58, %v760_v61  ;;  %v734_v58 = vld [vmem:[#allocation2 + $0x2b8] sm:$0xff]  ;;  %v733_v61 = vld [vmem:[#allocation2 + $0x2b0] sm:$0xff] }
 0x290   :  { %v2374_v49 = vsel %vm632_vm10, %v628_v59, %v636_v62  ;;  %v617_v0 = vadd.f32 %v611_v41, %v513_v36  ;;  %786 = vmatmul.f32.gmra.mxu2 %v764_v63  ;;  %815 = vmatmul.f32.gmra.mxu3 %v764_v63  ;;  %v718_v59 = vld [vmem:[#allocation2 + $0x240] sm:$0xff]  ;;  %v717_v36 = vld [vmem:[#allocation2 + $0x238] sm:$0xff]  ;;  %v716_v62 = vld [vmem:[#allocation2 + $0x230] sm:$0xff] }
 0x291   :  { %873 = vmatmul.f32.gmra.mxu1 %v764_v63  ;;  %v747_v1 = vmul.f32 %v1725_v54, %v2374_v49  ;;  %v698_v41 = vld [vmem:[#allocation2 + $0x1a8] sm:$0xff] }
 0x292   :  { %v623_v2 = vmul.f32 %v1723_v23, %v617_v0  ;;  %v715_v63 = vld [vmem:[#allocation2 + $0x228] sm:$0xff] }
 0x293   :  { %v753_v4 = vadd.f32 %v1726_v35, %v747_v1  ;;  %v732_v0 = vld [vmem:[#allocation2 + $0x2a8] sm:$0xff]  ;;  %v697_v1 = vld [vmem:[#allocation2 + $0x1a0] sm:$0xff] }
 0x294   :  { %v629_v6 = vadd.f32 %v1724_v27, %v623_v2  ;;  %v714_v2 = vld [vmem:[#allocation2 + $0x220] sm:$0xff] }
 0x295   :  { %vm757_vm11 = vcmp.gt.f32.partialorder %v753_v4, 0.0  ;;  %v761_v31 = vmul.f32 0.1, %v753_v4 }
 0x296   :  { %vm633_vm12 = vcmp.gt.f32.partialorder %v629_v6, 0.0  ;;  %v637_v7 = vmul.f32 0.1, %v629_v6 }
 0x297   :  { %v765_v9 = vsel %vm757_vm11, %v753_v4, %v761_v31  ;;  %v731_v4 = vld [vmem:[#allocation2 + $0x2a0] sm:$0xff]  ;;  %v713_v31 = vld [vmem:[#allocation2 + $0x218] sm:$0xff] }
 0x298   :  { %v2377_v10 = vsel %vm633_vm12, %v629_v6, %v637_v7  ;;  %789 = vmatmul.f32.gmra.mxu2 %v765_v9  ;;  %818 = vmatmul.f32.gmra.mxu3 %v765_v9  ;;  %v696_v6 = vld [vmem:[#allocation2 + $0x198] sm:$0xff] }
 0x299   :  { %876 = vmatmul.f32.gmra.mxu1 %v765_v9  ;;  %v748_v11 = vmul.f32 %v1725_v54, %v2377_v10  ;;  %v741_v54 = vld [vmem:[#allocation2 + $0x2f0] sm:$0xff]  ;;  %v730_v7 = vld [vmem:[#allocation2 + $0x298] sm:$0xff] }
 0x29a   :  { %v695_v9 = vld [vmem:[#allocation2 + $0x190] sm:$0xff] }
 0x29b   :  { %v754_v12 = vadd.f32 %v1726_v35, %v748_v11  ;;  %v705_v35 = vld [vmem:[#allocation2 + $0x1e0] sm:$0xff]  ;;  %v712_v11 = vld [vmem:[#allocation2 + $0x210] sm:$0xff] }
 0x29c   :  { %943 = vmatpush.msra.mxu3 %v705_v35 }
 0x29d   :  { %vm758_vm13 = vcmp.gt.f32.partialorder %v754_v12, 0.0  ;;  %v762_v13 = vmul.f32 0.1, %v754_v12 }
 0x29e   :  { %944 = vmatpush.msra.mxu3 %v704_v40 }
 0x29f   :  { %v766_v15 = vsel %vm758_vm13, %v754_v12, %v762_v13  ;;  %v729_v12 = vld [vmem:[#allocation2 + $0x290] sm:$0xff]  ;;  %v694_v13 = vld [vmem:[#allocation2 + $0x188] sm:$0xff] }
 0x2a0   :  { %792 = vmatmul.f32.gmra.mxu2 %v766_v15  ;;  %821 = vmatmul.f32.gmra.mxu3 %v766_v15 }
 0x2a1   :  { %879 = vmatmul.f32.gmra.mxu1 %v766_v15  ;;  %945 = vmatpush.msra.mxu3 %v703_v43  ;;  %v711_v15 = vld [vmem:[#allocation2 + $0x208] sm:$0xff] }
 0x2a3   :  { %946 = vmatpush.msra.mxu3 %v702_v46 }
 0x2a5   :  { %947 = vmatpush.msra.mxu3 %v701_v50 }
 0x2a7   :  { %948 = vmatpush.msra.mxu3 %v700_v55 }
 0x2a9   :  { %949 = vmatpush.msra.mxu3 %v699_v60 }
 0x2ab   :  { %950 = vmatpush.msra.mxu3 %v698_v41 }
 0x2ad   :  { %951 = vmatpush.msra.mxu3 %v697_v1 }
 0x2af   :  { %952 = vmatpush.msra.mxu3 %v696_v6 }
 0x2b1   :  { %953 = vmatpush.msra.mxu3 %v695_v9 }
 0x2b3   :  { %954 = vmatpush.msra.mxu3 %v694_v13  ;;  %v1115_v13 = vld [vmem:[#allocation2 + $0x378] sm:$0xff] }
 0x306   :  { %v871_v20 = vpop.f32.mrf.mxu1 }
 0x30b   :  { %v784_v21 = vpop.f32.mrf.mxu2 }
 0x30e   :  { %v874_v22 = vpop.f32.mrf.mxu1 }
 0x313   :  { %v787_v23 = vpop.f32.mrf.mxu2 }
 0x316   :  { %v877_v24 = vpop.f32.mrf.mxu1 }
 0x31b   :  { %v790_v25 = vpop.f32.mrf.mxu2 }
 0x31e   :  { %v880_v26 = vpop.f32.mrf.mxu1 }
 0x31f   :  { %895 = vmatpush.msra.mxu2 %v880_v26 }
 0x321   :  { %896 = vmatpush.msra.mxu2 %v877_v24  ;;  %v813_v24 = vpop.f32.mrf.mxu3 }
 0x323   :  { %897 = vmatpush.msra.mxu2 %v874_v22  ;;  %v793_v27 = vpop.f32.mrf.mxu2  ;;  %v710_v22 = vld [vmem:[#allocation2 + $0x200] sm:$0xff] }
 0x324   :  { %837 = vmatpush.msrb.mxu0 %v793_v27 }
 0x325   :  { %898 = vmatpush.msra.mxu2 %v871_v20  ;;  %v728_v20 = vld [vmem:[#allocation2 + $0x288] sm:$0xff] }
 0x326   :  { %838 = vmatpush.msrb.mxu0 %v790_v25  ;;  %1658 = vmatmul.msk.f32.vlgmr.msra.gmra.mxu2 %vm473_vm5, %v2322_v16 }
 0x327   :  { %1027 = vmatpush.msrb.mxu2 %v742_v29 }
 0x328   :  { %839 = vmatpush.msrb.mxu0 %v787_v23  ;;  %v727_v23 = vld [vmem:[#allocation2 + $0x280] sm:$0xff] }
 0x329   :  { %1028 = vmatpush.msrb.mxu2 %v741_v54  ;;  %v816_v54 = vpop.f32.mrf.mxu3 }
 0x32a   :  { %840 = vmatpush.msrb.mxu0 %v784_v21  ;;  %v693_v21 = vld [vmem:[#allocation2 + $0x180] sm:$0xff] }
 0x32b   :  { %1654 = vmatmul.msk.f32.vlgmr.msrb.gmra.mxu0 %vm473_vm5, %v2296_v3  ;;  %1029 = vmatpush.msrb.mxu2 %v740_v33 }
 0x32c   :  { %969 = vmatpush.msra.mxu0 %v725_v34  ;;  %955 = vmatpush.msra.mxu3 %v693_v21  ;;  %v1132_v21 = vld [vmem:[#allocation2 + $0x3f8] sm:$0xff] }
 0x32d   :  { %1030 = vmatpush.msrb.mxu2 %v739_v38 }
 0x32e   :  { %1659 = vmatmul.msk.f32.gmra.mxu2 %vm473_vm5, %v2331_v17  ;;  %970 = vmatpush.msra.mxu0 %v724_v39 }
 0x32f   :  { %1031 = vmatpush.msrb.mxu2 %v738_v57 }
 0x330   :  { %971 = vmatpush.msra.mxu0 %v723_v42 }
 0x331   :  { %1032 = vmatpush.msrb.mxu2 %v737_v44  ;;  %v819_v43 = vpop.f32.mrf.mxu3 }
 0x332   :  { %972 = vmatpush.msra.mxu0 %v722_v45 }
 0x333   :  { %1655 = vmatmul.msk.f32.gmra.mxu0 %vm473_vm5, %v2303_v5  ;;  %1033 = vmatpush.msrb.mxu2 %v736_v48 }
 0x334   :  { %973 = vmatpush.msra.mxu0 %v721_v47 }
 0x335   :  { %1034 = vmatpush.msrb.mxu2 %v735_v53 }
 0x336   :  { %1660 = vmatmul.msk.f32.gmra.mxu2 %vm473_vm5, %v2338_v18  ;;  %974 = vmatpush.msra.mxu0 %v720_v52 }
 0x337   :  { %1035 = vmatpush.msrb.mxu2 %v734_v58 }
 0x338   :  { %975 = vmatpush.msra.mxu0 %v719_v56 }
 0x339   :  { %1036 = vmatpush.msrb.mxu2 %v733_v61  ;;  %v822_v56 = vpop.f32.mrf.mxu3 }
 0x33a   :  { %976 = vmatpush.msra.mxu0 %v718_v59 }
 0x33b   :  { %1656 = vmatmul.msk.f32.gmra.mxu0 %vm473_vm5, %v2310_v8  ;;  %1037 = vmatpush.msrb.mxu2 %v732_v0 }
 0x33c   :  { %977 = vmatpush.msra.mxu0 %v717_v36 }
 0x33d   :  { %1038 = vmatpush.msrb.mxu2 %v731_v4 }
 0x33e   :  { %1661 = vmatmul.msk.f32.gmra.mxu2 %vm473_vm5, %v2345_v19  ;;  %978 = vmatpush.msra.mxu0 %v716_v62 }
 0x33f   :  { %1039 = vmatpush.msrb.mxu2 %v730_v7 }
 0x340   :  { %979 = vmatpush.msra.mxu0 %v715_v63 }
 0x341   :  { %1040 = vmatpush.msrb.mxu2 %v729_v12 }
 0x342   :  { %980 = vmatpush.msra.mxu0 %v714_v2 }
 0x343   :  { %1657 = vmatmul.msk.f32.gmra.mxu0 %vm473_vm5, %v2317_v14  ;;  %1041 = vmatpush.msrb.mxu2 %v728_v20  ;;  %v1113_v20 = vld [vmem:[#allocation2 + $0x368] sm:$0xff] }
 0x344   :  { %981 = vmatpush.msra.mxu0 %v713_v31 }
 0x345   :  { %1042 = vmatpush.msrb.mxu2 %v727_v23  ;;  %v1112_v23 = vld [vmem:[#allocation2 + $0x360] sm:$0xff] }
 0x346   :  { %982 = vmatpush.msra.mxu0 %v712_v11 }
 0x347   :  { %1686 = vmatpush.msra.mxu2 %v1115_v13 }
 0x348   :  { %983 = vmatpush.msra.mxu0 %v711_v15  ;;  %v1114_v15 = vld [vmem:[#allocation2 + $0x370] sm:$0xff] }
 0x349   :  { %1687 = vmatpush.msra.mxu2 %v1114_v15 }
 0x34a   :  { %984 = vmatpush.msra.mxu0 %v710_v22  ;;  %v1149_v22 = vld [vmem:[#allocation2 + $0x478] sm:$0xff] }
 0x34b   :  { %1688 = vmatpush.msra.mxu2 %v1113_v20 }
 0x34c   :  { %1225 = vmatpush.msrb.mxu0 %v1115_v13 }
 0x34d   :  { %1689 = vmatpush.msra.mxu2 %v1112_v23 }
 0x34e   :  { %1226 = vmatpush.msrb.mxu0 %v1114_v15 }
 0x350   :  { %1227 = vmatpush.msrb.mxu0 %v1113_v20 }
 0x352   :  { %1228 = vmatpush.msrb.mxu0 %v1112_v23 }
 0x3a8   :  { %v842_v25 = vpop.f32.mrf.mxu0 }
 0x3a9   :  { %v843_v26 = vadd.f32 %v842_v25, %v813_v24  ;;  %v900_v27 = vpop.f32.mrf.mxu2  ;;  %v1131_v24 = vld [vmem:[#allocation2 + $0x3f0] sm:$0xff] }
 0x3aa   :  { %v1148_v25 = vld [vmem:[#allocation2 + $0x470] sm:$0xff] }
 0x3ab   :  { %v912_v29 = vadd.f32 %v900_v27, %v843_v26  ;;  %v1111_v26 = vld [vmem:[#allocation2 + $0x358] sm:$0xff]  ;;  %v1130_v27 = vld [vmem:[#allocation2 + $0x3e8] sm:$0xff] }
 0x3ac   :  { %1229 = vmatpush.msrb.mxu0 %v1111_v26  ;;  %1690 = vmatpush.msra.mxu2 %v1111_v26 }
 0x3ad   :  { %v918_v32 = vmul.f32 %v1727_v28, %v912_v29  ;;  %v1110_v29 = vld [vmem:[#allocation2 + $0x350] sm:$0xff] }
 0x3ae   :  { %1230 = vmatpush.msrb.mxu0 %v1110_v29  ;;  %1691 = vmatpush.msra.mxu2 %v1110_v29 }
 0x3af   :  { %v924_v33 = vadd.f32 %v1728_v30, %v918_v32  ;;  %v1127_v32 = vld [vmem:[#allocation2 + $0x3d0] sm:$0xff] }
 0x3b0   :  { %v845_v34 = vpop.f32.mrf.mxu0 }
 0x3b1   :  { %v846_v35 = vadd.f32 %v845_v34, %v816_v54  ;;  %v903_v38 = vpop.f32.mrf.mxu2  ;;  %vm928_vm14 = vcmp.gt.f32.partialorder %v924_v33, 0.0  ;;  %v932_v39 = vmul.f32 0.1, %v924_v33  ;;  %v1146_v54 = vld [vmem:[#allocation2 + $0x460] sm:$0xff]  ;;  %v1126_v34 = vld [vmem:[#allocation2 + $0x3c8] sm:$0xff] }
 0x3b3   :  { %v913_v40 = vadd.f32 %v903_v38, %v846_v35  ;;  %v936_v57 = vsel %vm928_vm14, %v924_v33, %v932_v39  ;;  %v1144_v33 = vld [vmem:[#allocation2 + $0x450] sm:$0xff]  ;;  %v1108_v35 = vld [vmem:[#allocation2 + $0x340] sm:$0xff] }
 0x3b4   :  { %956 = vmatmul.f32.vlgmr.msra.gmra.mxu3 %v936_v57  ;;  %985 = vmatmul.f32.vlgmr.msra.gmra.mxu0 %v936_v57  ;;  %v1125_v38 = vld [vmem:[#allocation2 + $0x3c0] sm:$0xff] }
 0x3b5   :  { %v919_v42 = vmul.f32 %v1727_v28, %v913_v40  ;;  %1043 = vmatmul.f32.vlgmr.msrb.gmra.mxu2 %v936_v57  ;;  %v1142_v39 = vld [vmem:[#allocation2 + $0x440] sm:$0xff]  ;;  %v1107_v40 = vld [vmem:[#allocation2 + $0x338] sm:$0xff]  ;;  %v1140_v57 = vld [vmem:[#allocation2 + $0x430] sm:$0xff] }
 0x3b7   :  { %v925_v44 = vadd.f32 %v1728_v30, %v919_v42  ;;  %v1105_v42 = vld [vmem:[#allocation2 + $0x328] sm:$0xff] }
 0x3b8   :  { %v848_v45 = vpop.f32.mrf.mxu0 }
 0x3b9   :  { %v849_v46 = vadd.f32 %v848_v45, %v819_v43  ;;  %v906_v47 = vpop.f32.mrf.mxu2  ;;  %vm929_vm15 = vcmp.gt.f32.partialorder %v925_v44, 0.0  ;;  %v933_v48 = vmul.f32 0.1, %v925_v44  ;;  %v1122_v43 = vld [vmem:[#allocation2 + $0x3a8] sm:$0xff]  ;;  %v1104_v45 = vld [vmem:[#allocation2 + $0x320] sm:$0xff] }
 0x3bb   :  { %v914_v50 = vadd.f32 %v906_v47, %v849_v46  ;;  %v937_v52 = vsel %vm929_vm15, %v925_v44, %v933_v48  ;;  %v1139_v44 = vld [vmem:[#allocation2 + $0x428] sm:$0xff]  ;;  %v1121_v46 = vld [vmem:[#allocation2 + $0x3a0] sm:$0xff]  ;;  %v1103_v48 = vld [vmem:[#allocation2 + $0x318] sm:$0xff] }
 0x3bc   :  { %959 = vmatmul.f32.gmra.mxu3 %v937_v52  ;;  %988 = vmatmul.f32.gmra.mxu0 %v937_v52  ;;  %v1138_v47 = vld [vmem:[#allocation2 + $0x420] sm:$0xff] }
 0x3bd   :  { %v920_v53 = vmul.f32 %v1727_v28, %v914_v50  ;;  %1046 = vmatmul.f32.gmra.mxu2 %v937_v52  ;;  %v1120_v50 = vld [vmem:[#allocation2 + $0x398] sm:$0xff] }
 0x3be   :  { %v1137_v52 = vld [vmem:[#allocation2 + $0x418] sm:$0xff] }
 0x3bf   :  { %v926_v55 = vadd.f32 %v1728_v30, %v920_v53  ;;  %v1102_v53 = vld [vmem:[#allocation2 + $0x310] sm:$0xff] }
 0x3c0   :  { %v851_v58 = vpop.f32.mrf.mxu0 }
 0x3c1   :  { %v852_v60 = vadd.f32 %v851_v58, %v822_v56  ;;  %v909_v59 = vpop.f32.mrf.mxu2  ;;  %vm930_vm0 = vcmp.gt.f32.partialorder %v926_v55, 0.0  ;;  %v934_v61 = vmul.f32 0.1, %v926_v55  ;;  %v1136_v56 = vld [vmem:[#allocation2 + $0x410] sm:$0xff]  ;;  %v1101_v58 = vld [vmem:[#allocation2 + $0x308] sm:$0xff] }
 0x3c3   :  { %v915_v36 = vadd.f32 %v909_v59, %v852_v60  ;;  %v938_v62 = vsel %vm930_vm0, %v926_v55, %v934_v61  ;;  %v1119_v55 = vld [vmem:[#allocation2 + $0x390] sm:$0xff]  ;;  %v1118_v60 = vld [vmem:[#allocation2 + $0x388] sm:$0xff]  ;;  %v1100_v61 = vld [vmem:[#allocation2 + $0x300] sm:$0xff] }
 0x3c4   :  { %962 = vmatmul.f32.gmra.mxu3 %v938_v62  ;;  %991 = vmatmul.f32.gmra.mxu0 %v938_v62  ;;  %v1135_v59 = vld [vmem:[#allocation2 + $0x408] sm:$0xff] }
 0x3c5   :  { %v921_v41 = vmul.f32 %v1727_v28, %v915_v36  ;;  %1049 = vmatmul.f32.gmra.mxu2 %v938_v62  ;;  %v1147_v28 = vld [vmem:[#allocation2 + $0x468] sm:$0xff]  ;;  %v1117_v36 = vld [vmem:[#allocation2 + $0x380] sm:$0xff] }
 0x3c6   :  { %v1134_v62 = vld [vmem:[#allocation2 + $0x400] sm:$0xff] }
 0x3c7   :  { %v927_v63 = vadd.f32 %v1728_v30, %v921_v41  ;;  %v1129_v30 = vld [vmem:[#allocation2 + $0x3e0] sm:$0xff] }
 0x3c9   :  { %vm931_vm1 = vcmp.gt.f32.partialorder %v927_v63, 0.0  ;;  %v935_v0 = vmul.f32 0.1, %v927_v63 }
 0x3cb   :  { %v939_v1 = vsel %vm931_vm1, %v927_v63, %v935_v0 }
 0x3cc   :  { %965 = vmatmul.f32.gmra.mxu3 %v939_v1  ;;  %994 = vmatmul.f32.gmra.mxu0 %v939_v1 }
 0x3cd   :  { %1052 = vmatmul.f32.gmra.mxu2 %v939_v1 }
 0x431   :  { %v986_v41 = vpop.f32.mrf.mxu0 }
 0x437   :  { %v957_v2 = vpop.f32.mrf.mxu3 }
 0x438   :  { %v1044_v4 = vpop.f32.mrf.mxu2 }
 0x43f   :  { %v960_v6 = vpop.f32.mrf.mxu3 }
 0x440   :  { %v1047_v31 = vpop.f32.mrf.mxu2 }
 0x447   :  { %v963_v7 = vpop.f32.mrf.mxu3 }
 0x448   :  { %v1050_v9 = vpop.f32.mrf.mxu2 }
 0x44f   :  { %v966_v11 = vpop.f32.mrf.mxu3 }
 0x450   :  { %v1053_v12 = vpop.f32.mrf.mxu2  ;;  %1010 = vmatpush.msra.mxu1 %v966_v11 }
 0x451   :  { %1068 = vmatpush.msrb.mxu3 %v1053_v12  ;;  %v1731_v12 = vld [vmem:[%s2548_s8 + $0xa] ss:$0 sm:$0xff] }
 0x452   :  { %1011 = vmatpush.msra.mxu1 %v963_v7 }
 0x453   :  { %1069 = vmatpush.msrb.mxu3 %v1050_v9  ;;  %v1730_v9 = vld [vmem:[%s2548_s8 + $0x9] ss:$0 sm:$0xff] }
 0x454   :  { %1012 = vmatpush.msra.mxu1 %v960_v6 }
 0x455   :  { %1070 = vmatpush.msrb.mxu3 %v1047_v31  ;;  %v989_v31 = vpop.f32.mrf.mxu0 }
 0x456   :  { %1013 = vmatpush.msra.mxu1 %v957_v2 }
 0x457   :  { %1071 = vmatpush.msrb.mxu3 %v1044_v4  ;;  %1662 = vmatmul.msk.f32.vlgmr.msra.gmra.mxu1 %vm473_vm5, %v2296_v3  ;;  %v1128_v3 = vld [vmem:[#allocation2 + $0x3d8] sm:$0xff]  ;;  %v1729_v4 = vld [vmem:[%s2548_s8 + $0x8] ss:$0 sm:$0xff] }
 0x458   :  { %1666 = vmatmul.msk.f32.vlgmr.msrb.gmra.mxu3 %vm473_vm5, %v2322_v16  ;;  %1254 = vmatpush.msrb.mxu1 %v1132_v21  ;;  %v1145_v16 = vld [vmem:[#allocation2 + $0x458] sm:$0xff] }
 0x459   :  { %1312 = vmatpush.msra.mxu3 %v1149_v22 }
 0x45a   :  { %1255 = vmatpush.msrb.mxu1 %v1131_v24 }
 0x45b   :  { %1313 = vmatpush.msra.mxu3 %v1148_v25 }
 0x45c   :  { %1256 = vmatpush.msrb.mxu1 %v1130_v27 }
 0x45d   :  { %1314 = vmatpush.msra.mxu3 %v1147_v28  ;;  %v992_v25 = vpop.f32.mrf.mxu0 }
 0x45e   :  { %1257 = vmatpush.msrb.mxu1 %v1129_v30 }
 0x45f   :  { %1663 = vmatmul.msk.f32.gmra.mxu1 %vm473_vm5, %v2303_v5  ;;  %1315 = vmatpush.msra.mxu3 %v1146_v54  ;;  %v1109_v5 = vld [vmem:[#allocation2 + $0x348] sm:$0xff] }
 0x460   :  { %1667 = vmatmul.msk.f32.gmra.mxu3 %vm473_vm5, %v2331_v17  ;;  %1258 = vmatpush.msrb.mxu1 %v1128_v3  ;;  %v1143_v17 = vld [vmem:[#allocation2 + $0x448] sm:$0xff] }
 0x461   :  { %1316 = vmatpush.msra.mxu3 %v1145_v16  ;;  %1231 = vmatpush.msrb.mxu0 %v1109_v5 }
 0x462   :  { %1259 = vmatpush.msrb.mxu1 %v1127_v32  ;;  %1692 = vmatpush.msra.mxu2 %v1109_v5 }
 0x463   :  { %1317 = vmatpush.msra.mxu3 %v1144_v33  ;;  %1232 = vmatpush.msrb.mxu0 %v1108_v35 }
 0x464   :  { %1260 = vmatpush.msrb.mxu1 %v1126_v34  ;;  %1693 = vmatpush.msra.mxu2 %v1108_v35 }
 0x465   :  { %1318 = vmatpush.msra.mxu3 %v1143_v17  ;;  %1233 = vmatpush.msrb.mxu0 %v1107_v40  ;;  %v995_v34 = vpop.f32.mrf.mxu0 }
 0x466   :  { %1261 = vmatpush.msrb.mxu1 %v1125_v38  ;;  %1694 = vmatpush.msra.mxu2 %v1107_v40 }
 0x467   :  { %1664 = vmatmul.msk.f32.gmra.mxu1 %vm473_vm5, %v2310_v8  ;;  %v1124_v8 = vld [vmem:[#allocation2 + $0x3b8] sm:$0xff]  ;;  %1319 = vmatpush.msra.mxu3 %v1142_v39 }
 0x468   :  { %1668 = vmatmul.msk.f32.gmra.mxu3 %vm473_vm5, %v2338_v18  ;;  %v1141_v18 = vld [vmem:[#allocation2 + $0x438] sm:$0xff]  ;;  %1262 = vmatpush.msrb.mxu1 %v1124_v8 }
 0x469   :  { %1320 = vmatpush.msra.mxu3 %v1141_v18 }
 0x46b   :  { %1321 = vmatpush.msra.mxu3 %v1140_v57 }
 0x46d   :  { %1322 = vmatpush.msra.mxu3 %v1139_v44 }
 0x46f   :  { %1665 = vmatmul.msk.f32.gmra.mxu1 %vm473_vm5, %v2317_v14  ;;  %v1106_v14 = vld [vmem:[#allocation2 + $0x330] sm:$0xff]  ;;  %1323 = vmatpush.msra.mxu3 %v1138_v47 }
 0x470   :  { %1669 = vmatmul.msk.f32.gmra.mxu3 %vm473_vm5, %v2345_v19  ;;  %v1123_v19 = vld [vmem:[#allocation2 + $0x3b0] sm:$0xff]  ;;  %1234 = vmatpush.msrb.mxu0 %v1106_v14 }
 0x471   :  { %1263 = vmatpush.msrb.mxu1 %v1123_v19  ;;  %1695 = vmatpush.msra.mxu2 %v1106_v14 }
 0x472   :  { %1235 = vmatpush.msrb.mxu0 %v1105_v42  ;;  %1324 = vmatpush.msra.mxu3 %v1137_v52  ;;  %v1166_v52 = vld [vmem:[#allocation2 + $0x4f8] sm:$0xff] }
 0x473   :  { %1264 = vmatpush.msrb.mxu1 %v1122_v43  ;;  %1696 = vmatpush.msra.mxu2 %v1105_v42 }
 0x474   :  { %1236 = vmatpush.msrb.mxu0 %v1104_v45  ;;  %1325 = vmatpush.msra.mxu3 %v1136_v56  ;;  %v1164_v56 = vld [vmem:[#allocation2 + $0x4e8] sm:$0xff] }
 0x475   :  { %1265 = vmatpush.msrb.mxu1 %v1121_v46  ;;  %1697 = vmatpush.msra.mxu2 %v1104_v45 }
 0x476   :  { %1237 = vmatpush.msrb.mxu0 %v1103_v48  ;;  %1326 = vmatpush.msra.mxu3 %v1135_v59  ;;  %v1163_v59 = vld [vmem:[#allocation2 + $0x4e0] sm:$0xff] }
 0x477   :  { %1266 = vmatpush.msrb.mxu1 %v1120_v50  ;;  %1698 = vmatpush.msra.mxu2 %v1103_v48 }
 0x478   :  { %1238 = vmatpush.msrb.mxu0 %v1102_v53  ;;  %1327 = vmatpush.msra.mxu3 %v1134_v62  ;;  %v2453_v62 = vld [vmem:[%s2542_s2 + $0x20] sm:$0xff] }
 0x479   :  { %1267 = vmatpush.msrb.mxu1 %v1119_v55  ;;  %1699 = vmatpush.msra.mxu2 %v1102_v53  ;;  %v1165_v55 = vld [vmem:[#allocation2 + $0x4f0] sm:$0xff] }
 0x47a   :  { %1239 = vmatpush.msrb.mxu0 %v1101_v58  ;;  %1702 = vmatpush.msrb.mxu3 %v1166_v52 }
 0x47b   :  { %1268 = vmatpush.msrb.mxu1 %v1118_v60  ;;  %1700 = vmatpush.msra.mxu2 %v1101_v58  ;;  %v1183_v58 = vld [vmem:[#allocation2 + $0x578] sm:$0xff] }
 0x47c   :  { %1240 = vmatpush.msrb.mxu0 %v1100_v61  ;;  %1703 = vmatpush.msrb.mxu3 %v1165_v55  ;;  %v1200_v60 = vld [vmem:[#allocation2 + $0x5f8] sm:$0xff] }
 0x47d   :  { %1269 = vmatpush.msrb.mxu1 %v1117_v36  ;;  %1701 = vmatpush.msra.mxu2 %v1100_v61  ;;  %v2446_v61 = vld [vmem:[%s2542_s2] sm:$0xff]  ;;  %v1182_v36 = vld [vmem:[#allocation2 + $0x570] sm:$0xff] }
 0x47e   :  { %1704 = vmatpush.msrb.mxu3 %v1164_v56 }
 0x47f   :  { %1398 = vmatpush.msra.mxu1 %v1166_v52 }
 0x480   :  { %1705 = vmatpush.msrb.mxu3 %v1163_v59 }
 0x481   :  { %1399 = vmatpush.msra.mxu1 %v1165_v55 }
 0x483   :  { %1400 = vmatpush.msra.mxu1 %v1164_v56 }
 0x485   :  { %1401 = vmatpush.msra.mxu1 %v1163_v59 }
 0x4d4   :  { %v1015_v63 = vpop.f32.mrf.mxu1 }
 0x4d5   :  { %v1016_v0 = vadd.f32 %v1015_v63, %v986_v41  ;;  %v1199_v41 = vld [vmem:[#allocation2 + $0x5f0] sm:$0xff]  ;;  %v1162_v63 = vld [vmem:[#allocation2 + $0x4d8] sm:$0xff] }
 0x4d6   :  { %1402 = vmatpush.msra.mxu1 %v1162_v63  ;;  %1706 = vmatpush.msrb.mxu3 %v1162_v63 }
 0x4db   :  { %v1073_v1 = vpop.f32.mrf.mxu3 }
 0x4dc   :  { %v1085_v2 = vadd.f32 %v1073_v1, %v1016_v0  ;;  %v1018_v6 = vpop.f32.mrf.mxu1  ;;  %v1181_v0 = vld [vmem:[#allocation2 + $0x568] sm:$0xff] }
 0x4dd   :  { %v1019_v15 = vadd.f32 %v1018_v6, %v989_v31  ;;  %v1198_v1 = vld [vmem:[#allocation2 + $0x5e8] sm:$0xff]  ;;  %v1197_v6 = vld [vmem:[#allocation2 + $0x5e0] sm:$0xff]  ;;  %v1179_v31 = vld [vmem:[#allocation2 + $0x558] sm:$0xff] }
 0x4de   :  { %v1089_v7 = vadd.f32 %v1085_v2, %v2366_v37  ;;  %v1161_v2 = vld [vmem:[#allocation2 + $0x4d0] sm:$0xff] }
 0x4df   :  { %1403 = vmatpush.msra.mxu1 %v1161_v2  ;;  %1707 = vmatpush.msrb.mxu3 %v1161_v2 }
 0x4e0   :  { %v2425_v11 = vadd.f32 %v1729_v4, %v1089_v7  ;;  %v1196_v7 = vld [vmem:[#allocation2 + $0x5d8] sm:$0xff] }
 0x4e2   :  { %v1203_v13 = vmul.f32 %v1730_v9, %v2425_v11 }
 0x4e3   :  { %v1076_v20 = vpop.f32.mrf.mxu3 }
 0x4e4   :  { %v1086_v21 = vadd.f32 %v1076_v20, %v1019_v15  ;;  %v1209_v22 = vadd.f32 %v1731_v12, %v1203_v13  ;;  %v1021_v23 = vpop.f32.mrf.mxu1  ;;  %v1178_v13 = vld [vmem:[#allocation2 + $0x550] sm:$0xff]  ;;  %v2467_v15 = vld [vmem:[%s2542_s2 + $0x28] sm:$0xff] }
 0x4e5   :  { %v1022_v29 = vadd.f32 %v1021_v23, %v992_v25  ;;  %v1195_v20 = vld [vmem:[#allocation2 + $0x5d0] sm:$0xff]  ;;  %v1194_v23 = vld [vmem:[#allocation2 + $0x5c8] sm:$0xff]  ;;  %v1193_v25 = vld [vmem:[#allocation2 + $0x5c0] sm:$0xff] }
 0x4e6   :  { %v1090_v24 = vadd.f32 %v1086_v21, %v2370_v51  ;;  %vm1213_vm2 = vcmp.gt.f32.partialorder %v1209_v22, 0.0  ;;  %v1217_v37 = vmul.f32 0.1, %v1209_v22  ;;  %v1159_v21 = vld [vmem:[#allocation2 + $0x4c0] sm:$0xff] }
 0x4e8   :  { %v2432_v26 = vadd.f32 %v1729_v4, %v1090_v24  ;;  %v1221_v27 = vsel %vm1213_vm2, %v1209_v22, %v1217_v37  ;;  %v1177_v22 = vld [vmem:[#allocation2 + $0x548] sm:$0xff]  ;;  %v1158_v24 = vld [vmem:[#allocation2 + $0x4b8] sm:$0xff]  ;;  %v1176_v37 = vld [vmem:[#allocation2 + $0x540] sm:$0xff] }
 0x4e9   :  { %1241 = vmatmul.f32.vlgmr.msrb.gmra.mxu0 %v1221_v27  ;;  %1270 = vmatmul.f32.vlgmr.msrb.gmra.mxu1 %v1221_v27 }
 0x4ea   :  { %v1204_v28 = vmul.f32 %v1730_v9, %v2432_v26  ;;  %1328 = vmatmul.f32.vlgmr.msra.gmra.mxu3 %v1221_v27  ;;  %v1175_v27 = vld [vmem:[#allocation2 + $0x538] sm:$0xff] }
 0x4eb   :  { %v1079_v30 = vpop.f32.mrf.mxu3 }
 0x4ec   :  { %v1087_v54 = vadd.f32 %v1079_v30, %v1022_v29  ;;  %v1210_v3 = vadd.f32 %v1731_v12, %v1204_v28  ;;  %v1024_v51 = vpop.f32.mrf.mxu1  ;;  %v1192_v28 = vld [vmem:[#allocation2 + $0x5b8] sm:$0xff]  ;;  %v1157_v29 = vld [vmem:[#allocation2 + $0x4b0] sm:$0xff] }
 0x4ed   :  { %v1025_v35 = vadd.f32 %v1024_v51, %v995_v34  ;;  %v2474_v30 = vld [vmem:[%s2542_s2 + $0x10] sm:$0xff]  ;;  %v2495_v51 = vld [vmem:[%s2542_s2 + $0x38] sm:$0xff]  ;;  %v1173_v34 = vld [vmem:[#allocation2 + $0x528] sm:$0xff] }
 0x4ee   :  { %v1091_v16 = vadd.f32 %v1087_v54, %v2374_v49  ;;  %vm1214_vm3 = vcmp.gt.f32.partialorder %v1210_v3, 0.0  ;;  %v1218_v32 = vmul.f32 0.1, %v1210_v3  ;;  %v1174_v54 = vld [vmem:[#allocation2 + $0x530] sm:$0xff] }
 0x4f0   :  { %v2436_v33 = vadd.f32 %v1729_v4, %v1091_v16  ;;  %v1222_v5 = vsel %vm1214_vm3, %v1210_v3, %v1218_v32  ;;  %v2481_v3 = vld [vmem:[%s2542_s2 + $0x30] sm:$0xff]  ;;  %v2488_v32 = vld [vmem:[%s2542_s2 + $0x18] sm:$0xff] }
 0x4f1   :  { %1244 = vmatmul.f32.gmra.mxu0 %v1222_v5  ;;  %1273 = vmatmul.f32.gmra.mxu1 %v1222_v5  ;;  %v1191_v16 = vld [vmem:[#allocation2 + $0x5b0] sm:$0xff] }
 0x4f2   :  { %v1205_v17 = vmul.f32 %v1730_v9, %v2436_v33  ;;  %1331 = vmatmul.f32.gmra.mxu3 %v1222_v5  ;;  %v1156_v5 = vld [vmem:[#allocation2 + $0x4a8] sm:$0xff] }
 0x4f3   :  { %v1082_v38 = vpop.f32.mrf.mxu3 }
 0x4f4   :  { %v1088_v39 = vadd.f32 %v1082_v38, %v1025_v35  ;;  %v1211_v40 = vadd.f32 %v1731_v12, %v1205_v17  ;;  %v1190_v17 = vld [vmem:[#allocation2 + $0x5a8] sm:$0xff]  ;;  %v1155_v35 = vld [vmem:[#allocation2 + $0x4a0] sm:$0xff] }
 0x4f5   :  { %v1172_v38 = vld [vmem:[#allocation2 + $0x520] sm:$0xff] }
 0x4f6   :  { %v1092_v8 = vadd.f32 %v1088_v39, %v2377_v10  ;;  %vm1215_vm4 = vcmp.gt.f32.partialorder %v1211_v40, 0.0  ;;  %v1219_v49 = vmul.f32 0.1, %v1211_v40  ;;  %v1189_v39 = vld [vmem:[#allocation2 + $0x5a0] sm:$0xff] }
 0x4f8   :  { %v2440_v18 = vadd.f32 %v1729_v4, %v1092_v8  ;;  %v1223_v14 = vsel %vm1215_vm4, %v1211_v40, %v1219_v49  ;;  %v1180_v4 = vld [vmem:[#allocation2 + $0x560] sm:$0xff]  ;;  %v1154_v40 = vld [vmem:[#allocation2 + $0x498] sm:$0xff] }
 0x4f9   :  { %1247 = vmatmul.f32.gmra.mxu0 %v1223_v14  ;;  %1276 = vmatmul.f32.gmra.mxu1 %v1223_v14  ;;  %v1171_v8 = vld [vmem:[#allocation2 + $0x518] sm:$0xff] }
 0x4fa   :  { %v1206_v19 = vmul.f32 %v1730_v9, %v2440_v18  ;;  %1334 = vmatmul.f32.gmra.mxu3 %v1223_v14  ;;  %v1160_v9 = vld [vmem:[#allocation2 + $0x4c8] sm:$0xff]  ;;  %v1188_v49 = vld [vmem:[#allocation2 + $0x598] sm:$0xff]  ;;  %v1153_v14 = vld [vmem:[#allocation2 + $0x490] sm:$0xff] }
 0x4fb   :  { %1404 = vmatpush.msra.mxu1 %v1160_v9  ;;  %1708 = vmatpush.msrb.mxu3 %v1160_v9 }
 0x4fc   :  { %v1212_v57 = vadd.f32 %v1731_v12, %v1206_v19  ;;  %v2460_v12 = vld [vmem:[%s2542_s2 + $0x8] sm:$0xff]  ;;  %v1170_v19 = vld [vmem:[#allocation2 + $0x510] sm:$0xff] }
 0x4fd   :  { %1405 = vmatpush.msra.mxu1 %v1159_v21  ;;  %1709 = vmatpush.msrb.mxu3 %v1159_v21 }
 0x4fe   :  { %vm1216_vm6 = vcmp.gt.f32.partialorder %v1212_v57, 0.0  ;;  %v1220_v42 = vmul.f32 0.1, %v1212_v57 }
 0x4ff   :  { %1406 = vmatpush.msra.mxu1 %v1158_v24  ;;  %1710 = vmatpush.msrb.mxu3 %v1158_v24 }
 0x500   :  { %v1224_v43 = vsel %vm1216_vm6, %v1212_v57, %v1220_v42  ;;  %v1187_v57 = vld [vmem:[#allocation2 + $0x590] sm:$0xff]  ;;  %v1152_v42 = vld [vmem:[#allocation2 + $0x488] sm:$0xff] }
 0x501   :  { %1250 = vmatmul.f32.vlgmr.msra.gmra.mxu2 %v1224_v43  ;;  %1279 = vmatmul.f32.gmra.mxu1 %v1224_v43 }
 0x502   :  { %1337 = vmatmul.f32.gmra.mxu3 %v1224_v43  ;;  %1407 = vmatpush.msra.mxu1 %v1157_v29  ;;  %v1169_v43 = vld [vmem:[#allocation2 + $0x508] sm:$0xff] }
 0x503   :  { %1711 = vmatpush.msrb.mxu3 %v1157_v29 }
 0x504   :  { %1408 = vmatpush.msra.mxu1 %v1156_v5 }
 0x505   :  { %1712 = vmatpush.msrb.mxu3 %v1156_v5 }
 0x506   :  { %1409 = vmatpush.msra.mxu1 %v1155_v35 }
 0x507   :  { %1713 = vmatpush.msrb.mxu3 %v1155_v35 }
 0x508   :  { %1410 = vmatpush.msra.mxu1 %v1154_v40 }
 0x509   :  { %1714 = vmatpush.msrb.mxu3 %v1154_v40 }
 0x50a   :  { %1411 = vmatpush.msra.mxu1 %v1153_v14 }
 0x50b   :  { %1715 = vmatpush.msrb.mxu3 %v1153_v14 }
 0x50c   :  { %1412 = vmatpush.msra.mxu1 %v1152_v42 }
 0x50d   :  { %1716 = vmatpush.msrb.mxu3 %v1152_v42 }
 0x566   :  { %v1242_v45 = vpop.f32.mrf.mxu0 }
 0x56d   :  { %v1329_v44 = vpop.f32.mrf.mxu3 }
 0x56e   :  { %v1245_v46 = vpop.f32.mrf.mxu0 }
 0x575   :  { %v1332_v10 = vpop.f32.mrf.mxu3 }
 0x576   :  { %v1248_v53 = vpop.f32.mrf.mxu0 }
 0x57d   :  { %v1335_v47 = vpop.f32.mrf.mxu3 }
 0x584   :  { %v1251_v48 = vpop.f32.mrf.mxu2 }
 0x585   :  { %v1338_v50 = vpop.f32.mrf.mxu3  ;;  %1295 = vmatpush.msrb.mxu2 %v1251_v48 }
 0x586   :  { %1353 = vmatpush.msra.mxu0 %v1338_v50 }
 0x587   :  { %1296 = vmatpush.msrb.mxu2 %v1248_v53  ;;  %v1732_v53 = vld [vmem:[%s2548_s8 + $0xb] ss:$0 sm:$0xff] }
 0x588   :  { %1354 = vmatpush.msra.mxu0 %v1335_v47  ;;  %v1271_v47 = vpop.f32.mrf.mxu1 }
 0x589   :  { %1297 = vmatpush.msrb.mxu2 %v1245_v46  ;;  %v1185_v46 = vld [vmem:[#allocation2 + $0x580] sm:$0xff] }
 0x58a   :  { %1355 = vmatpush.msra.mxu0 %v1332_v10  ;;  %v1168_v10 = vld [vmem:[#allocation2 + $0x500] sm:$0xff] }
 0x58b   :  { %1298 = vmatpush.msrb.mxu2 %v1242_v45  ;;  %v1151_v45 = vld [vmem:[#allocation2 + $0x480] sm:$0xff] }
 0x58c   :  { %1356 = vmatpush.msra.mxu0 %v1329_v44  ;;  %1670 = vmatmul.msk.f32.vlgmr.msrb.gmra.mxu2 %vm473_vm5, %v2446_v61  ;;  %v1186_v44 = vld [vmem:[#allocation2 + $0x588] sm:$0xff] }
 0x58d   :  { %1674 = vmatmul.msk.f32.vlgmr.msra.gmra.mxu0 %vm473_vm5, %v2453_v62  ;;  %1427 = vmatpush.msra.mxu2 %v1183_v58  ;;  %v1733_v58 = vld [vmem:[%s2548_s8 + $0xc] ss:$0 sm:$0xff] }
 0x58e   :  { %1485 = vmatpush.msrb.mxu0 %v1200_v60  ;;  %1413 = vmatpush.msra.mxu1 %v1151_v45 }
 0x58f   :  { %1428 = vmatpush.msra.mxu2 %v1182_v36  ;;  %1717 = vmatpush.msrb.mxu3 %v1151_v45 }
 0x590   :  { %1486 = vmatpush.msrb.mxu0 %v1199_v41  ;;  %v1274_v55 = vpop.f32.mrf.mxu1 }
 0x591   :  { %1429 = vmatpush.msra.mxu2 %v1181_v0 }
 0x592   :  { %1487 = vmatpush.msrb.mxu0 %v1198_v1 }
 0x593   :  { %1430 = vmatpush.msra.mxu2 %v1180_v4 }
 0x594   :  { %1671 = vmatmul.msk.f32.gmra.mxu2 %vm473_vm5, %v2460_v12  ;;  %1488 = vmatpush.msrb.mxu0 %v1197_v6 }
 0x595   :  { %1675 = vmatmul.msk.f32.gmra.mxu0 %vm473_vm5, %v2467_v15  ;;  %1431 = vmatpush.msra.mxu2 %v1179_v31 }
 0x596   :  { %1489 = vmatpush.msrb.mxu0 %v1196_v7 }
 0x597   :  { %1432 = vmatpush.msra.mxu2 %v1178_v13 }
 0x598   :  { %1490 = vmatpush.msrb.mxu0 %v1195_v20  ;;  %v1277_v4 = vpop.f32.mrf.mxu1 }
 0x599   :  { %1433 = vmatpush.msra.mxu2 %v1177_v22 }
 0x59a   :  { %1491 = vmatpush.msrb.mxu0 %v1194_v23 }
 0x59b   :  { %1434 = vmatpush.msra.mxu2 %v1176_v37 }
 0x59c   :  { %1672 = vmatmul.msk.f32.gmra.mxu2 %vm473_vm5, %v2474_v30  ;;  %1492 = vmatpush.msrb.mxu0 %v1193_v25 }
 0x59d   :  { %1676 = vmatmul.msk.f32.gmra.mxu0 %vm473_vm5, %v2481_v3  ;;  %1435 = vmatpush.msra.mxu2 %v1175_v27 }
 0x59e   :  { %1493 = vmatpush.msrb.mxu0 %v1192_v28 }
 0x59f   :  { %1436 = vmatpush.msra.mxu2 %v1174_v54 }
 0x5a0   :  { %1494 = vmatpush.msrb.mxu0 %v1191_v16  ;;  %v1280_v24 = vpop.f32.mrf.mxu1 }
 0x5a1   :  { %1437 = vmatpush.msra.mxu2 %v1173_v34 }
 0x5a2   :  { %1495 = vmatpush.msrb.mxu0 %v1190_v17 }
 0x5a3   :  { %1438 = vmatpush.msra.mxu2 %v1172_v38 }
 0x5a4   :  { %1673 = vmatmul.msk.f32.gmra.mxu2 %vm473_vm5, %v2488_v32  ;;  %1496 = vmatpush.msrb.mxu0 %v1189_v39 }
 0x5a5   :  { %1677 = vmatmul.msk.f32.gmra.mxu0 %vm473_vm5, %v2495_v51  ;;  %1439 = vmatpush.msra.mxu2 %v1171_v8 }
 0x5a6   :  { %1497 = vmatpush.msrb.mxu0 %v1188_v49 }
 0x5a7   :  { %1440 = vmatpush.msra.mxu2 %v1170_v19 }
 0x5a8   :  { %1498 = vmatpush.msrb.mxu0 %v1187_v57 }
 0x5a9   :  { %1441 = vmatpush.msra.mxu2 %v1169_v43 }
 0x5aa   :  { %1499 = vmatpush.msrb.mxu0 %v1186_v44 }
 0x5ab   :  { %1442 = vmatpush.msra.mxu2 %v1168_v10 }
 0x5ac   :  { %1500 = vmatpush.msrb.mxu0 %v1185_v46 }
 0x60a   :  { %v1358_v48 = vpop.f32.mrf.mxu0 }
 0x60f   :  { %v1300_v50 = vpop.f32.mrf.mxu2 }
 0x610   :  { %v1301_v52 = vadd.f32 %v1300_v50, %v1271_v47 }
 0x612   :  { %v1370_v56 = vadd.f32 %v1358_v48, %v1301_v52  ;;  %v1361_v60 = vpop.f32.mrf.mxu0 }
 0x614   :  { %v1376_v59 = vmul.f32 %v1732_v53, %v1370_v56 }
 0x616   :  { %v1382_v36 = vadd.f32 %v1733_v58, %v1376_v59 }
 0x617   :  { %v1303_v41 = vpop.f32.mrf.mxu2 }
 0x618   :  { %v1304_v63 = vadd.f32 %v1303_v41, %v1274_v55  ;;  %vm1386_vm7 = vcmp.gt.f32.partialorder %v1382_v36, 0.0  ;;  %v1390_v0 = vmul.f32 0.1, %v1382_v36 }
 0x61a   :  { %v1371_v1 = vadd.f32 %v1361_v60, %v1304_v63  ;;  %v1394_v2 = vsel %vm1386_vm7, %v1382_v36, %v1390_v0  ;;  %v1364_v31 = vpop.f32.mrf.mxu0 }
 0x61b   :  { %1414 = vmatmul.f32.vlgmr.msra.gmra.mxu1 %v1394_v2  ;;  %1443 = vmatmul.f32.vlgmr.msra.gmra.mxu2 %v1394_v2 }
 0x61c   :  { %v1377_v6 = vmul.f32 %v1732_v53, %v1371_v1  ;;  %1501 = vmatmul.f32.vlgmr.msrb.gmra.mxu0 %v1394_v2 }
 0x61e   :  { %v1383_v7 = vadd.f32 %v1733_v58, %v1377_v6 }
 0x61f   :  { %v1306_v9 = vpop.f32.mrf.mxu2 }
 0x620   :  { %v1307_v13 = vadd.f32 %v1306_v9, %v1277_v4  ;;  %vm1387_vm8 = vcmp.gt.f32.partialorder %v1383_v7, 0.0  ;;  %v1391_v20 = vmul.f32 0.1, %v1383_v7 }
 0x622   :  { %v1372_v21 = vadd.f32 %v1364_v31, %v1307_v13  ;;  %v1395_v22 = vsel %vm1387_vm8, %v1383_v7, %v1391_v20  ;;  %v1367_v27 = vpop.f32.mrf.mxu0 }
 0x623   :  { %1417 = vmatmul.f32.gmra.mxu1 %v1395_v22  ;;  %1446 = vmatmul.f32.gmra.mxu2 %v1395_v22 }
 0x624   :  { %v1378_v23 = vmul.f32 %v1732_v53, %v1372_v21  ;;  %1504 = vmatmul.f32.gmra.mxu0 %v1395_v22 }
 0x626   :  { %v1384_v37 = vadd.f32 %v1733_v58, %v1378_v23 }
 0x627   :  { %v1309_v25 = vpop.f32.mrf.mxu2 }
 0x628   :  { %v1310_v28 = vadd.f32 %v1309_v25, %v1280_v24  ;;  %vm1388_vm9 = vcmp.gt.f32.partialorder %v1384_v37, 0.0  ;;  %v1392_v29 = vmul.f32 0.1, %v1384_v37 }
 0x62a   :  { %v1373_v54 = vadd.f32 %v1367_v27, %v1310_v28  ;;  %v1396_v16 = vsel %vm1388_vm9, %v1384_v37, %v1392_v29 }
 0x62b   :  { %1420 = vmatmul.f32.gmra.mxu1 %v1396_v16  ;;  %1449 = vmatmul.f32.gmra.mxu2 %v1396_v16 }
 0x62c   :  { %v1379_v5 = vmul.f32 %v1732_v53, %v1373_v54  ;;  %1507 = vmatmul.f32.gmra.mxu0 %v1396_v16 }
 0x62e   :  { %v1385_v34 = vadd.f32 %v1733_v58, %v1379_v5 }
 0x630   :  { %v1393_v17 = vmul.f32 0.1, %v1385_v34  ;;  %vm1389_vm10 = vcmp.gt.f32.partialorder %v1385_v34, 0.0 }
 0x632   :  { %v1397_v35 = vsel %vm1389_vm10, %v1385_v34, %v1393_v17 }
 0x633   :  { %1423 = vmatmul.f32.vlgmr.msrb.gmra.mxu3 %v1397_v35  ;;  %1452 = vmatmul.f32.gmra.mxu2 %v1397_v35 }
 0x634   :  { %1510 = vmatmul.f32.gmra.mxu0 %v1397_v35 }
 0x698   :  { %v1415_v40 = vpop.f32.mrf.mxu1 }
 0x699   :  { %v1502_v38 = vpop.f32.mrf.mxu0 }
 0x6a0   :  { %v1418_v49 = vpop.f32.mrf.mxu1 }
 0x6a1   :  { %v1505_v39 = vpop.f32.mrf.mxu0 }
 0x6a8   :  { %v1421_v57 = vpop.f32.mrf.mxu1 }
 0x6a9   :  { %v1508_v8 = vpop.f32.mrf.mxu0 }
 0x6b1   :  { %v1511_v14 = vpop.f32.mrf.mxu0 }
 0x6b2   :  { %1526 = vmatpush.msrb.mxu1 %v1511_v14 }
 0x6b4   :  { %1527 = vmatpush.msrb.mxu1 %v1508_v8 }
 0x6b6   :  { %1528 = vmatpush.msrb.mxu1 %v1505_v39  ;;  %v1424_v19 = vpop.f32.mrf.mxu3 }
 0x6b7   :  { %1468 = vmatpush.msra.mxu3 %v1424_v19 }
 0x6b8   :  { %1529 = vmatpush.msrb.mxu1 %v1502_v38 }
 0x6b9   :  { %1469 = vmatpush.msra.mxu3 %v1421_v57  ;;  %1682 = vmatmul.msk.f32.vlgmr.msrb.gmra.mxu1 %vm473_vm5, %v2453_v62  ;;  %v1444_v62 = vpop.f32.mrf.mxu2 }
 0x6bb   :  { %1470 = vmatpush.msra.mxu3 %v1418_v49 }
 0x6bd   :  { %1471 = vmatpush.msra.mxu3 %v1415_v40 }
 0x6be   :  { %1678 = vmatmul.msk.f32.vlgmr.msra.gmra.mxu3 %vm473_vm5, %v2446_v61 }
 0x6c1   :  { %1683 = vmatmul.msk.f32.gmra.mxu1 %vm473_vm5, %v2467_v15  ;;  %v1447_v15 = vpop.f32.mrf.mxu2 }
 0x6c6   :  { %1679 = vmatmul.msk.f32.gmra.mxu3 %vm473_vm5, %v2460_v12  ;;  %v1734_v12 = vld [vmem:[%s2548_s8 + $0xd] ss:$0 sm:$0xff] }
 0x6c9   :  { %1684 = vmatmul.msk.f32.gmra.mxu1 %vm473_vm5, %v2481_v3  ;;  %v1450_v46 = vpop.f32.mrf.mxu2 }
 0x6ce   :  { %1680 = vmatmul.msk.f32.gmra.mxu3 %vm473_vm5, %v2474_v30 }
 0x6d1   :  { %1685 = vmatmul.msk.f32.gmra.mxu1 %vm473_vm5, %v2495_v51  ;;  %v1453_v56 = vpop.f32.mrf.mxu2 }
 0x6d6   :  { %1681 = vmatmul.msk.f32.gmra.mxu3 %vm473_vm5, %v2488_v32 }
 0x736   :  { %v1531_v61 = vpop.f32.mrf.mxu1 }
 0x73e   :  { %v1534_v3 = vpop.f32.mrf.mxu1 }
 0x741   :  { %v1473_v42 = vpop.f32.mrf.mxu3 }
 0x742   :  { %v1474_v43 = vadd.f32 %v1473_v42, %v1444_v62 }
 0x744   :  { %v1543_v44 = vadd.f32 %v1531_v61, %v1474_v43 }
 0x746   :  { %v1547_v45 = vadd.f32 %v1543_v44, %v2425_v11  ;;  %v1537_v48 = vpop.f32.mrf.mxu1 }
 0x748   :  { %v1553_v30 = vadd.f32 %v1734_v12, %v1547_v45 }
 0x749   :  { %v1476_v10 = vpop.f32.mrf.mxu3 }
 0x74a   :  { %1557 = vst [vmem:[%s2549_s9] sm:$0xff] %v1553_v30  ;;  %v1477_v32 = vadd.f32 %v1476_v10, %v1447_v15 }
 0x74c   :  { %v1544_v51 = vadd.f32 %v1534_v3, %v1477_v32 }
 0x74e   :  { %v1548_v47 = vadd.f32 %v1544_v51, %v2432_v26  ;;  %v1540_v59 = vpop.f32.mrf.mxu1 }
 0x750   :  { %v1554_v50 = vadd.f32 %v1734_v12, %v1548_v47 }
 0x751   :  { %v1479_v52 = vpop.f32.mrf.mxu3 }
 0x752   :  { %1558 = vst [vmem:[%s2549_s9 + $0x8] sm:$0xff] %v1554_v50  ;;  %v1480_v53 = vadd.f32 %v1479_v52, %v1450_v46 }
 0x754   :  { %v1545_v11 = vadd.f32 %v1537_v48, %v1480_v53 }
 0x756   :  { %v1549_v55 = vadd.f32 %v1545_v11, %v2436_v33 }
 0x758   :  { %v1555_v58 = vadd.f32 %v1734_v12, %v1549_v55 }
 0x759   :  { %v1482_v60 = vpop.f32.mrf.mxu3 }
 0x75a   :  { %1559 = vst [vmem:[%s2549_s9 + $0x10] sm:$0xff] %v1555_v58  ;;  %v1483_v26 = vadd.f32 %v1482_v60, %v1453_v56 }
 0x75c   :  { %v1546_v36 = vadd.f32 %v1540_v59, %v1483_v26 }
 0x75e   :  { %v1550_v41 = vadd.f32 %v1546_v36, %v2440_v18 }
 0x760   :  { %v1556_v63 = vadd.f32 %v1734_v12, %v1550_v41 }
 0x762   :  { %1560 = vst [vmem:[%s2549_s9 + $0x18] sm:$0xff] %v1556_v63 }
 0x763   :  { %1565 = vsyncpa [#allocation3], 1 }

</bundles_post_ra>
